<compile_context>
chip_gen: v6e
topology: v6e:2x2x1
jax: 0.10.0
libtpu: 0.0.40
codegen_flags: <defaults>
</compile_context>

<pallas_src>
import functools

import jax
import jax.numpy as jnp
import numpy as np
from jax import lax
from jax.experimental import pallas as pl
from jax.experimental.pallas import tpu as pltpu


def _round_up(x, m):
    return (x + m - 1) // m * m


# ----------------------------------------------------------------------------
# Fused kernel: single program; batch folded into the lane axis.
# Activations are (channels, L) with L = N * NPP, NPP = round_up(Hp*Wp, 128) lane-dense.
# Convs are stride-1 "full frame" convs computed as ONE MXU dot each over a tap-stacked
# contraction axis; the valid/strided output window is selected by an in-kernel mask (for the
# SE pooling) and by a cheap crop in the XLA glue.
# ----------------------------------------------------------------------------
def cfs_kernel(x_ref, w_ref, s_ref, out_ref, *, K, dilation, same_pad, Wp, NPP, NB,
               delta, stride, Ho, Wo):
    Cin_pad, L = x_ref.shape
    Cout = out_ref.shape[0]
    mid = (s_ref.shape[1] - 2) // 2
    inv_hw = 1.0 / float(Ho * Wo)

    xf = x_ref[...]                                   # (Cin_pad, L) zero-padded images, lane-dense
    wv = w_ref[...]                                   # (Cin_pad + 2*Cout, K*K*Cin_pad)
    sv = s_ref[...]                                   # (Cin_pad + 2*Cout, 2 + 2*mid)

    def shift_left(v, off):
        # shifted[:, p] = v[:, (p + off) mod L].  Wraparound (incl. across the folded batch
        # boundary) only ever lands on positions outside the valid output window / outside the
        # real image, which are masked or cropped away - guaranteed by the wrapper asserts.
        s = (L - off) % L
        return pltpu.roll(v, s, axis=1) if s else v

    # Common tap-offset convention for all three convolutions.
    offs = [(kh * Wp + kw) * dilation for kh in range(K) for kw in range(K)]

    # Shifted-input stack: taps stacked along the contraction axis.  Each (Cin_pad, L) chunk is a
    # whole f32 sublane tile, so the concat is an aligned copy.  Shared by same_conv + mask_conv.
    xstack = jnp.concatenate([shift_left(xf, o) for o in offs], axis=0)   # (K*K*Cin_pad, L)

    # ---- MXU dot #1: same_conv and mask_conv together (weights stacked along M) ----
    sm = jnp.dot(wv[0:Cin_pad + Cout], xstack,
                 preferred_element_type=jnp.float32)                     # (Cin_pad + Cout, L)

    b_same = sv[0:Cin_pad, 0:1]
    b_mask = sv[Cin_pad:Cin_pad + Cout, 0:1]
    b_conv = sv[Cin_pad + Cout:Cin_pad + 2 * Cout, 0:1]

    # The shared offset convention leaves the same_conv result shifted by -same_pad*(Wp+1);
    # a single roll realigns it with xf.  xf is exactly zero outside the real image, so garbage
    # gate values there are nulled by the multiply below.
    sp = same_pad * (Wp + 1)
    gate = sm[0:Cin_pad] + b_same
    if sp:
        gate = pltpu.roll(gate, sp, axis=1)
    gated = jax.nn.sigmoid(gate) * xf                                     # (Cin_pad, L)

    # ---- MXU dot #2: conv2d(gated) ----
    gstack = jnp.concatenate([shift_left(gated, o) for o in offs], axis=0)
    xconv = jnp.dot(wv[Cin_pad + Cout:Cin_pad + 2 * Cout], gstack,
                    preferred_element_type=jnp.float32) + b_conv          # (Cout, L)
    mconv = sm[Cin_pad:Cin_pad + Cout] + b_mask
    # LeakyReLU(0.2) (max is exact for slope < 1) * sigmoid mask
    h = jnp.maximum(xconv, 0.2 * xconv) * jax.nn.sigmoid(mconv)           # (Cout, L)

    # ---- valid-output mask built in-kernel (1/(Ho*Wo) folded in).  f32 index math is exact for
    #      these small integers and avoids relying on vector integer div/rem lowering. ----
    pos = lax.broadcasted_iota(jnp.int32, (1, L), 1).astype(jnp.float32)
    local = pos - float(NPP) * jnp.floor(pos / float(NPP))
    fh = jnp.floor(local / float(Wp))
    fw = local - float(Wp) * fh

    def _ok(i, n_out):
        ok = (i >= float(delta)) & (i <= float(delta + (n_out - 1) * stride))
        if stride > 1:
            r = (i - float(delta)) - float(stride) * jnp.floor((i - float(delta)) / float(stride))
            ok = ok & (r == 0.0)
        return ok

    vrow = jnp.where(_ok(fh, Ho) & _ok(fw, Wo), inv_hw, 0.0)              # (1, L)

    # ---- Squeeze-Excitation per image (VPU/XLU only; no tiny MXU matmuls) ----
    w1k = sv[0:Cout, 1:1 + mid]                      # (Cout, mid)  Linear1 weight, in x out
    b1r = sv[Cout:Cout + 1, 1:1 + mid]               # (1, mid)
    w2k = sv[0:Cout, 1 + mid:1 + 2 * mid]            # (Cout, mid)  Linear2 weight, out x in
    b2c = sv[0:Cout, 1 + 2 * mid:2 + 2 * mid]        # (Cout, 1)

    hm = h * vrow
    for n in range(NB):                              # static unroll over the folded batch
        y = jnp.sum(hm[:, n * NPP:(n + 1) * NPP], axis=1, keepdims=True)          # (Cout, 1)
        z1 = jnp.maximum(jnp.sum(y * w1k, axis=0, keepdims=True) + b1r, 0.0)      # (1, mid)
        s2 = jax.nn.sigmoid(jnp.sum(w2k * z1, axis=1, keepdims=True) + b2c)       # (Cout, 1)
        out_ref[:, pl.ds(n * NPP, NPP)] = (h[:, n * NPP:(n + 1) * NPP] * s2).astype(out_ref.dtype)


# ----------------------------------------------------------------------------
# Wrapper: single pad/flatten (batch folded into lanes), packed weights, one pallas_call with
# only 3 operands, cheap output crop.
# ----------------------------------------------------------------------------
@functools.partial(jax.jit, static_argnames=("k", "stride", "padding", "dilation"))
def cfs_forward(x, params, *, k, stride=1, padding=0, dilation=1):
    N, Cin, H, W = x.shape
    ws, bs = params["same"]              # (Cin, Cin, k, k), (Cin,)        (PyTorch OIHW)
    wc, bc = params["conv"]              # (Cout, Cin, k, k), (Cout,)
    wm, bm = params["mask"]
    w1, b1 = params["lin1"]              # (mid, Cout), (mid,)             (PyTorch (out, in))
    w2, b2 = params["lin2"]              # (Cout, mid), (Cout,)
    Cout = wc.shape[0]
    mid = w1.shape[0]
    Cin_pad = _round_up(Cin, 8)          # whole f32 sublane tiles per tap chunk

    assert ((k - 1) * dilation) % 2 == 0, "same_conv2d must preserve spatial size"
    same_pad = (k - 1) * dilation // 2
    pad_all = max(same_pad, padding)
    delta = pad_all - padding            # offset of valid conv outputs inside the padded frame
    Hp, Wp = H + 2 * pad_all, W + 2 * pad_all
    Ho = (H + 2 * padding - dilation * (k - 1) - 1) // stride + 1
    Wo = (W + 2 * padding - dilation * (k - 1) - 1) // stride + 1
    NP = Hp * Wp
    NPP = _round_up(NP, 128)             # per-image lane-dense flat spatial length
    L = N * NPP                          # batch folded into the lane axis

    # Static geometry guards: roll wraparound can never reach a value that feeds a valid output
    # or an image-region gate value (see shift_left / gate-realign comments in the kernel).
    assert pad_all >= same_pad
    assert delta + (Ho - 1) * stride + (k - 1) * dilation <= Hp - 1
    assert delta + (Wo - 1) * stride + (k - 1) * dilation <= Wp - 1
    assert pad_all + (H - 1) + same_pad <= Hp - 1
    assert pad_all + (W - 1) + same_pad <= Wp - 1

    # --- glue: zero-pad channels + spatial, flatten, fold batch into lanes -> (Cin_pad, L) ---
    xp = jnp.pad(x, ((0, 0), (0, Cin_pad - Cin), (pad_all, pad_all), (pad_all, pad_all)))
    xp = xp.reshape(N, Cin_pad, NP)
    xp = jnp.pad(xp, ((0, 0), (0, 0), (0, NPP - NP)))
    xflat = jnp.transpose(xp, (1, 0, 2)).reshape(Cin_pad, L).astype(jnp.float32)

    # --- packed conv weights: tap-major along K, zero-padded input channels; all three convs in
    #     one array with rows [same (Cin_pad) | mask (Cout) | conv (Cout)] ---
    def stack_taps(w):                   # OIHW (O, Cin, k, k) -> (O, k*k*Cin_pad)
        O = w.shape[0]
        wp_ = jnp.zeros((O, Cin_pad, k, k), jnp.float32).at[:, :Cin].set(w)
        return jnp.transpose(wp_, (0, 2, 3, 1)).reshape(O, k * k * Cin_pad)

    wsame_s = jnp.zeros((Cin_pad, k * k * Cin_pad), jnp.float32).at[:Cin].set(stack_taps(ws))
    wpack = jnp.concatenate([wsame_s, stack_taps(wm), stack_taps(wc)], axis=0)

    # --- packed biases + SE params (one small operand, sliced statically inside the kernel) ---
    R = Cin_pad + 2 * Cout
    spack = jnp.zeros((R, 2 + 2 * mid), jnp.float32)
    spack = spack.at[:, 0].set(jnp.concatenate([jnp.pad(bs, (0, Cin_pad - Cin)), bm, bc]))
    spack = spack.at[:Cout, 1:1 + mid].set(jnp.transpose(w1))      # (Cout, mid), in x out
    spack = spack.at[Cout, 1:1 + mid].set(b1)
    spack = spack.at[:Cout, 1 + mid:1 + 2 * mid].set(w2)           # (Cout, mid), out x in
    spack = spack.at[:Cout, 1 + 2 * mid].set(b2)

    kern = functools.partial(cfs_kernel, K=k, dilation=dilation, same_pad=same_pad, Wp=Wp,
                             NPP=NPP, NB=N, delta=delta, stride=stride, Ho=Ho, Wo=Wo)

    out_frame = pl.pallas_call(
        kern,
        out_shape=jax.ShapeDtypeStruct((Cout, L), x.dtype),
        grid=(1,),
        in_specs=[
            pl.BlockSpec((Cin_pad, L), lambda i: (0, 0)),
            pl.BlockSpec((R, k * k * Cin_pad), lambda i: (0, 0)),
            pl.BlockSpec((R, 2 + 2 * mid), lambda i: (0, 0)),
        ],
        out_specs=pl.BlockSpec((Cout, L), lambda i: (0, 0)),
    )(xflat, wpack, spack)

    # --- glue: unfold batch, crop the valid (strided) output window.  stride == 1 here, so the
    #     full-frame store wastes nothing; for large strided configs do this selection in-kernel.
    of = jnp.transpose(out_frame.reshape(Cout, N, NPP), (1, 0, 2))[:, :, :NP]
    of = of.reshape(N, Cout, Hp, Wp)
    out = of[:, :, delta:delta + (Ho - 1) * stride + 1:stride,
             delta:delta + (Wo - 1) * stride + 1:stride]
    return out                                                      # NCHW (N, Cout, Ho, Wo)


# ----------------------------------------------------------------------------
# Deterministic parameter setup (synthetic weights; spectral norm applied as a weight
# pre-normalization via power iteration, matching nn.utils.spectral_norm's effect at eval).
# ----------------------------------------------------------------------------
def _spectral_sigma(w2d, iters=50):
    v = jnp.ones((w2d.shape[1],), w2d.dtype)
    u = jnp.ones((w2d.shape[0],), w2d.dtype)
    for _ in range(iters):
        u = w2d @ v
        u = u / (jnp.linalg.norm(u) + 1e-12)
        v = w2d.T @ u
        v = v / (jnp.linalg.norm(v) + 1e-12)
    return jnp.dot(u, w2d @ v)


def make_conv_params(key, cin, cout, k, spectral_norm=True):
    kw_key, kb_key = jax.random.split(key)
    w = jax.random.normal(kw_key, (cout, cin, k, k), jnp.float32) * 0.2   # OIHW, like PyTorch
    b = jax.random.normal(kb_key, (cout,), jnp.float32) * 0.1
    if spectral_norm:
        w = w / _spectral_sigma(w.reshape(cout, -1))
    return w, b


def make_linear_params(key, fin, fout, spectral_norm=True):
    kw_key, kb_key = jax.random.split(key)
    w = jax.random.normal(kw_key, (fout, fin), jnp.float32) * 0.2         # (out, in), like PyTorch
    b = jax.random.normal(kb_key, (fout,), jnp.float32) * 0.1
    if spectral_norm:
        w = w / _spectral_sigma(w)
    return w, b


# ----------------------------------------------------------------------------
# Pure-JAX reference of the same forward (NCHW), for the correctness check.
# ----------------------------------------------------------------------------
def ref_forward(x, params, *, k, stride, padding, dilation):
    ws, bs = params["same"]
    wc, bc = params["conv"]
    wm, bm = params["mask"]
    w1, b1 = params["lin1"]
    w2, b2 = params["lin2"]
    same_pad = (k - 1) * dilation // 2

    def conv(inp, w, b, s, p):
        out = lax.conv_general_dilated(
            inp, w, (s, s), [(p, p), (p, p)],
            rhs_dilation=(dilation, dilation),
            dimension_numbers=("NCHW", "OIHW", "NCHW"))
        return out + b.reshape(1, -1, 1, 1)

    gate = jax.nn.sigmoid(conv(x, ws, bs, 1, same_pad))
    xc = conv(gate * x, wc, bc, stride, padding)
    mask = jax.nn.sigmoid(conv(x, wm, bm, stride, padding))
    h = jnp.where(xc >= 0, xc, 0.2 * xc) * mask
    y = jnp.mean(h, axis=(2, 3), keepdims=True)                                 # (N, Cout, 1, 1)
    y = jnp.maximum(jnp.einsum("nchw,mc->nmhw", y, w1) + b1.reshape(1, -1, 1, 1), 0.0)
    y = jax.nn.sigmoid(jnp.einsum("nmhw,cm->nchw", y, w2) + b2.reshape(1, -1, 1, 1))
    return h * y


# ----------------------------------------------------------------------------
if __name__ == "__main__":
    key = jax.random.PRNGKey(0)
    kx, ks, kc, km, k1, k2 = jax.random.split(key, 6)

    # CFSModule(in_channels=4, out_channels=16, kernel_size=3, stride=1, padding=1)
    N, Cin, H, W = 2, 4, 16, 16
    Cout = 16
    ksize, stride, padding, dilation = 3, 1, 1, 1
    reduction = 16                       # 16 % 16 == 0 -> mid = 1
    mid = Cout // reduction

    x = jax.random.normal(kx, (N, Cin, H, W), jnp.float32)       # NCHW, like the PyTorch module

    params = {
        "same": make_conv_params(ks, Cin, Cin, ksize),
        "conv": make_conv_params(kc, Cin, Cout, ksize),
        "mask": make_conv_params(km, Cin, Cout, ksize),
        "lin1": make_linear_params(k1, Cout, mid),
        "lin2": make_linear_params(k2, mid, Cout),
    }

    out = jax.block_until_ready(
        cfs_forward(x, params, k=ksize, stride=stride, padding=padding, dilation=dilation))
    ref = jax.block_until_ready(
        ref_forward(x, params, k=ksize, stride=stride, padding=padding, dilation=dilation))

    assert out.shape == (N, Cout, H, W), out.shape
    np.testing.assert_allclose(np.asarray(out), np.asarray(ref), rtol=1e-4, atol=1e-4)
    print("KERNEL_OK")
</pallas_src>

<mosaic_0001>
module attributes {stable_mosaic.version = 11 : i64} {
  func.func @cfs_kernel(%arg0: i32, %arg1: memref<8x768xf32, #tpu.memory_space<vmem>>, %arg2: memref<40x72xf32, #tpu.memory_space<vmem>>, %arg3: memref<40x4xf32, #tpu.memory_space<vmem>>, %arg4: memref<16x768xf32, #tpu.memory_space<vmem>>) attributes {dimension_semantics = [#tpu.dimension_semantics<arbitrary>], iteration_bounds = array<i64: 1>, scalar_prefetch = 0 : i64, scratch_operands = 0 : i64, tpu.core_type = #tpu.core_type<tc>, window_params = [{pipeline_mode = #tpu.pipeline_mode<synchronous>, transform_indices = @transform_0, window_bounds = array<i64: 8, 768>}, {pipeline_mode = #tpu.pipeline_mode<synchronous>, transform_indices = @transform_1, window_bounds = array<i64: 40, 72>}, {pipeline_mode = #tpu.pipeline_mode<synchronous>, transform_indices = @transform_2, window_bounds = array<i64: 40, 4>}, {pipeline_mode = #tpu.pipeline_mode<synchronous>, transform_indices = @transform_3, window_bounds = array<i64: 16, 768>}]} {
    %c0 = arith.constant 0 : index
    %c0_0 = arith.constant 0 : index
    %0 = vector.load %arg1[%c0, %c0_0] : memref<8x768xf32, #tpu.memory_space<vmem>>, vector<8x768xf32>
    %c0_1 = arith.constant 0 : index
    %c0_2 = arith.constant 0 : index
    %1 = vector.load %arg2[%c0_1, %c0_2] : memref<40x72xf32, #tpu.memory_space<vmem>>, vector<40x72xf32>
    %c0_3 = arith.constant 0 : index
    %c0_4 = arith.constant 0 : index
    %2 = vector.load %arg3[%c0_3, %c0_4] : memref<40x4xf32, #tpu.memory_space<vmem>>, vector<40x4xf32>
    %c767_i32 = arith.constant 767 : i32
    %3 = tpu.dynamic_rotate %0 by %c767_i32 dim 1 : vector<8x768xf32>, i32 -> vector<8x768xf32>
    %c766_i32 = arith.constant 766 : i32
    %4 = tpu.dynamic_rotate %0 by %c766_i32 dim 1 : vector<8x768xf32>, i32 -> vector<8x768xf32>
    %c750_i32 = arith.constant 750 : i32
    %5 = tpu.dynamic_rotate %0 by %c750_i32 dim 1 : vector<8x768xf32>, i32 -> vector<8x768xf32>
    %c749_i32 = arith.constant 749 : i32
    %6 = tpu.dynamic_rotate %0 by %c749_i32 dim 1 : vector<8x768xf32>, i32 -> vector<8x768xf32>
    %c748_i32 = arith.constant 748 : i32
    %7 = tpu.dynamic_rotate %0 by %c748_i32 dim 1 : vector<8x768xf32>, i32 -> vector<8x768xf32>
    %c732_i32 = arith.constant 732 : i32
    %8 = tpu.dynamic_rotate %0 by %c732_i32 dim 1 : vector<8x768xf32>, i32 -> vector<8x768xf32>
    %c731_i32 = arith.constant 731 : i32
    %9 = tpu.dynamic_rotate %0 by %c731_i32 dim 1 : vector<8x768xf32>, i32 -> vector<8x768xf32>
    %c730_i32 = arith.constant 730 : i32
    %10 = tpu.dynamic_rotate %0 by %c730_i32 dim 1 : vector<8x768xf32>, i32 -> vector<8x768xf32>
    %11 = tpu.concatenate %0, %3, %4, %5, %6, %7, %8, %9, %10 in 0 : vector<8x768xf32>, vector<8x768xf32>, vector<8x768xf32>, vector<8x768xf32>, vector<8x768xf32>, vector<8x768xf32>, vector<8x768xf32>, vector<8x768xf32>, vector<8x768xf32> -> vector<72x768xf32>
    %12 = vector.extract_strided_slice %1 {offsets = [0, 0], sizes = [24, 72], strides = [1, 1]} : vector<40x72xf32> to vector<24x72xf32>
    %cst = arith.constant dense<0.000000e+00> : vector<24x768xf32>
    %13 = tpu.matmul %12, %11, %cst {dimension_numbers = #tpu.dot_dimension_numbers<[1], [0], [0], [1], [0, 0, 1, 1], [], []>} : vector<24x72xf32>, vector<72x768xf32>, vector<24x768xf32> -> vector<24x768xf32>
    %14 = vector.extract_strided_slice %2 {offsets = [0, 0], sizes = [8, 1], strides = [1, 1]} : vector<40x4xf32> to vector<8x1xf32>
    %15 = vector.extract_strided_slice %2 {offsets = [8, 0], sizes = [16, 1], strides = [1, 1]} : vector<40x4xf32> to vector<16x1xf32>
    %16 = vector.extract_strided_slice %2 {offsets = [24, 0], sizes = [16, 1], strides = [1, 1]} : vector<40x4xf32> to vector<16x1xf32>
    %17 = vector.extract_strided_slice %13 {offsets = [0, 0], sizes = [8, 768], strides = [1, 1]} : vector<24x768xf32> to vector<8x768xf32>
    %18 = vector.broadcast %14 : vector<8x1xf32> to vector<8x768xf32>
    %19 = arith.addf %17, %18 : vector<8x768xf32>
    %c19_i32 = arith.constant 19 : i32
    %20 = tpu.dynamic_rotate %19 by %c19_i32 dim 1 : vector<8x768xf32>, i32 -> vector<8x768xf32>
    %21 = arith.negf %20 : vector<8x768xf32>
    %22 = math.exp %21 : vector<8x768xf32>
    %cst_5 = arith.constant 1.000000e+00 : f32
    %23 = vector.broadcast %cst_5 : f32 to vector<8x768xf32>
    %24 = arith.addf %23, %22 : vector<8x768xf32>
    %25 = arith.divf %23, %24 : vector<8x768xf32>
    %26 = arith.mulf %25, %0 : vector<8x768xf32>
    %c767_i32_6 = arith.constant 767 : i32
    %27 = tpu.dynamic_rotate %26 by %c767_i32_6 dim 1 : vector<8x768xf32>, i32 -> vector<8x768xf32>
    %c766_i32_7 = arith.constant 766 : i32
    %28 = tpu.dynamic_rotate %26 by %c766_i32_7 dim 1 : vector<8x768xf32>, i32 -> vector<8x768xf32>
    %c750_i32_8 = arith.constant 750 : i32
    %29 = tpu.dynamic_rotate %26 by %c750_i32_8 dim 1 : vector<8x768xf32>, i32 -> vector<8x768xf32>
    %c749_i32_9 = arith.constant 749 : i32
    %30 = tpu.dynamic_rotate %26 by %c749_i32_9 dim 1 : vector<8x768xf32>, i32 -> vector<8x768xf32>
    %c748_i32_10 = arith.constant 748 : i32
    %31 = tpu.dynamic_rotate %26 by %c748_i32_10 dim 1 : vector<8x768xf32>, i32 -> vector<8x768xf32>
    %c732_i32_11 = arith.constant 732 : i32
    %32 = tpu.dynamic_rotate %26 by %c732_i32_11 dim 1 : vector<8x768xf32>, i32 -> vector<8x768xf32>
    %c731_i32_12 = arith.constant 731 : i32
    %33 = tpu.dynamic_rotate %26 by %c731_i32_12 dim 1 : vector<8x768xf32>, i32 -> vector<8x768xf32>
    %c730_i32_13 = arith.constant 730 : i32
    %34 = tpu.dynamic_rotate %26 by %c730_i32_13 dim 1 : vector<8x768xf32>, i32 -> vector<8x768xf32>
    %35 = tpu.concatenate %26, %27, %28, %29, %30, %31, %32, %33, %34 in 0 : vector<8x768xf32>, vector<8x768xf32>, vector<8x768xf32>, vector<8x768xf32>, vector<8x768xf32>, vector<8x768xf32>, vector<8x768xf32>, vector<8x768xf32>, vector<8x768xf32> -> vector<72x768xf32>
    %36 = vector.extract_strided_slice %1 {offsets = [24, 0], sizes = [16, 72], strides = [1, 1]} : vector<40x72xf32> to vector<16x72xf32>
    %cst_14 = arith.constant dense<0.000000e+00> : vector<16x768xf32>
    %37 = tpu.matmul %36, %35, %cst_14 {dimension_numbers = #tpu.dot_dimension_numbers<[1], [0], [0], [1], [0, 0, 1, 1], [], []>} : vector<16x72xf32>, vector<72x768xf32>, vector<16x768xf32> -> vector<16x768xf32>
    %38 = vector.broadcast %16 : vector<16x1xf32> to vector<16x768xf32>
    %39 = arith.addf %37, %38 : vector<16x768xf32>
    %40 = vector.extract_strided_slice %13 {offsets = [8, 0], sizes = [16, 768], strides = [1, 1]} : vector<24x768xf32> to vector<16x768xf32>
    %41 = vector.broadcast %15 : vector<16x1xf32> to vector<16x768xf32>
    %42 = arith.addf %40, %41 : vector<16x768xf32>
    %cst_15 = arith.constant 2.000000e-01 : f32
    %43 = vector.broadcast %cst_15 : f32 to vector<16x768xf32>
    %44 = arith.mulf %43, %39 : vector<16x768xf32>
    %45 = arith.maximumf %39, %44 : vector<16x768xf32>
    %46 = arith.negf %42 : vector<16x768xf32>
    %47 = math.exp %46 : vector<16x768xf32>
    %cst_16 = arith.constant 1.000000e+00 : f32
    %48 = vector.broadcast %cst_16 : f32 to vector<16x768xf32>
    %49 = arith.addf %48, %47 : vector<16x768xf32>
    %50 = arith.divf %48, %49 : vector<16x768xf32>
    %51 = arith.mulf %45, %50 : vector<16x768xf32>
    %52 = tpu.iota {dimensions = array<i32: 1>} : vector<1x768xi32>
    %53 = arith.sitofp %52 : vector<1x768xi32> to vector<1x768xf32>
    %cst_17 = arith.constant 3.840000e+02 : f32
    %54 = vector.broadcast %cst_17 : f32 to vector<1x768xf32>
    %55 = arith.divf %53, %54 : vector<1x768xf32>
    %56 = math.floor %55 : vector<1x768xf32>
    %cst_18 = arith.constant 3.840000e+02 : f32
    %57 = vector.broadcast %cst_18 : f32 to vector<1x768xf32>
    %58 = arith.mulf %57, %56 : vector<1x768xf32>
    %59 = arith.subf %53, %58 : vector<1x768xf32>
    %cst_19 = arith.constant 1.800000e+01 : f32
    %60 = vector.broadcast %cst_19 : f32 to vector<1x768xf32>
    %61 = arith.divf %59, %60 : vector<1x768xf32>
    %62 = math.floor %61 : vector<1x768xf32>
    %cst_20 = arith.constant 1.800000e+01 : f32
    %63 = vector.broadcast %cst_20 : f32 to vector<1x768xf32>
    %64 = arith.mulf %63, %62 : vector<1x768xf32>
    %65 = arith.subf %59, %64 : vector<1x768xf32>
    %cst_21 = arith.constant 0.000000e+00 : f32
    %66 = vector.broadcast %cst_21 : f32 to vector<1x768xf32>
    %67 = arith.cmpf oge, %62, %66 : vector<1x768xf32>
    %cst_22 = arith.constant 1.500000e+01 : f32
    %68 = vector.broadcast %cst_22 : f32 to vector<1x768xf32>
    %69 = arith.cmpf ole, %62, %68 : vector<1x768xf32>
    %70 = arith.andi %67, %69 : vector<1x768xi1>
    %cst_23 = arith.constant 0.000000e+00 : f32
    %71 = vector.broadcast %cst_23 : f32 to vector<1x768xf32>
    %72 = arith.cmpf oge, %65, %71 : vector<1x768xf32>
    %cst_24 = arith.constant 1.500000e+01 : f32
    %73 = vector.broadcast %cst_24 : f32 to vector<1x768xf32>
    %74 = arith.cmpf ole, %65, %73 : vector<1x768xf32>
    %75 = arith.andi %72, %74 : vector<1x768xi1>
    %76 = arith.andi %70, %75 : vector<1x768xi1>
    %cst_25 = arith.constant 3.906250e-03 : f32
    %cst_26 = arith.constant 0.000000e+00 : f32
    %77 = vector.broadcast %cst_25 : f32 to vector<1x768xf32>
    %78 = vector.broadcast %cst_26 : f32 to vector<1x768xf32>
    %79 = arith.select %76, %77, %78 : vector<1x768xi1>, vector<1x768xf32>
    %80 = vector.extract_strided_slice %2 {offsets = [0, 1], sizes = [16, 1], strides = [1, 1]} : vector<40x4xf32> to vector<16x1xf32>
    %81 = vector.extract_strided_slice %2 {offsets = [16, 1], sizes = [1, 1], strides = [1, 1]} : vector<40x4xf32> to vector<1x1xf32>
    %82 = vector.extract_strided_slice %2 {offsets = [0, 2], sizes = [16, 1], strides = [1, 1]} : vector<40x4xf32> to vector<16x1xf32>
    %83 = vector.extract_strided_slice %2 {offsets = [0, 3], sizes = [16, 1], strides = [1, 1]} : vector<40x4xf32> to vector<16x1xf32>
    %84 = vector.broadcast %79 : vector<1x768xf32> to vector<16x768xf32>
    %85 = arith.mulf %51, %84 : vector<16x768xf32>
    %86 = vector.extract_strided_slice %85 {offsets = [0, 0], sizes = [16, 384], strides = [1, 1]} : vector<16x768xf32> to vector<16x384xf32>
    %cst_27 = arith.constant dense<0.000000e+00> : vector<16xf32>
    %87 = vector.multi_reduction <add>, %86, %cst_27 [1] : vector<16x384xf32> to vector<16xf32>
    %88 = vector.shape_cast %87 : vector<16xf32> to vector<16x1xf32>
    %89 = arith.mulf %88, %80 : vector<16x1xf32>
    %cst_28 = arith.constant dense<0.000000e+00> : vector<1xf32>
    %90 = vector.multi_reduction <add>, %89, %cst_28 [0] : vector<16x1xf32> to vector<1xf32>
    %91 = vector.shape_cast %90 : vector<1xf32> to vector<1x1xf32>
    %92 = arith.addf %91, %81 : vector<1x1xf32>
    %cst_29 = arith.constant 0.000000e+00 : f32
    %93 = vector.broadcast %cst_29 : f32 to vector<1x1xf32>
    %94 = arith.maximumf %92, %93 : vector<1x1xf32>
    %95 = vector.broadcast %94 : vector<1x1xf32> to vector<16x1xf32>
    %96 = arith.mulf %82, %95 : vector<16x1xf32>
    %cst_30 = arith.constant dense<0.000000e+00> : vector<16xf32>
    %97 = vector.multi_reduction <add>, %96, %cst_30 [1] : vector<16x1xf32> to vector<16xf32>
    %98 = vector.shape_cast %97 : vector<16xf32> to vector<16x1xf32>
    %99 = arith.addf %98, %83 : vector<16x1xf32>
    %100 = arith.negf %99 : vector<16x1xf32>
    %101 = math.exp %100 : vector<16x1xf32>
    %cst_31 = arith.constant 1.000000e+00 : f32
    %102 = vector.broadcast %cst_31 : f32 to vector<16x1xf32>
    %103 = arith.addf %102, %101 : vector<16x1xf32>
    %104 = arith.divf %102, %103 : vector<16x1xf32>
    %105 = vector.extract_strided_slice %51 {offsets = [0, 0], sizes = [16, 384], strides = [1, 1]} : vector<16x768xf32> to vector<16x384xf32>
    %106 = vector.broadcast %104 : vector<16x1xf32> to vector<16x384xf32>
    %107 = arith.mulf %105, %106 : vector<16x384xf32>
    %c0_32 = arith.constant 0 : index
    %c0_33 = arith.constant 0 : index
    %108 = vector.load %arg4[%c0_32, %c0_33] : memref<16x768xf32, #tpu.memory_space<vmem>>, vector<16x384xf32>
    tpu.vector_store %arg4[%c0_32, %c0_33], %107 {strides = array<i32>} : memref<16x768xf32, #tpu.memory_space<vmem>>, vector<16x384xf32>,
    %109 = vector.extract_strided_slice %85 {offsets = [0, 384], sizes = [16, 384], strides = [1, 1]} : vector<16x768xf32> to vector<16x384xf32>
    %cst_34 = arith.constant dense<0.000000e+00> : vector<16xf32>
    %110 = vector.multi_reduction <add>, %109, %cst_34 [1] : vector<16x384xf32> to vector<16xf32>
    %111 = vector.shape_cast %110 : vector<16xf32> to vector<16x1xf32>
    %112 = arith.mulf %111, %80 : vector<16x1xf32>
    %cst_35 = arith.constant dense<0.000000e+00> : vector<1xf32>
    %113 = vector.multi_reduction <add>, %112, %cst_35 [0] : vector<16x1xf32> to vector<1xf32>
    %114 = vector.shape_cast %113 : vector<1xf32> to vector<1x1xf32>
    %115 = arith.addf %114, %81 : vector<1x1xf32>
    %cst_36 = arith.constant 0.000000e+00 : f32
    %116 = vector.broadcast %cst_36 : f32 to vector<1x1xf32>
    %117 = arith.maximumf %115, %116 : vector<1x1xf32>
    %118 = vector.broadcast %117 : vector<1x1xf32> to vector<16x1xf32>
    %119 = arith.mulf %82, %118 : vector<16x1xf32>
    %cst_37 = arith.constant dense<0.000000e+00> : vector<16xf32>
    %120 = vector.multi_reduction <add>, %119, %cst_37 [1] : vector<16x1xf32> to vector<16xf32>
    %121 = vector.shape_cast %120 : vector<16xf32> to vector<16x1xf32>
    %122 = arith.addf %121, %83 : vector<16x1xf32>
    %123 = arith.negf %122 : vector<16x1xf32>
    %124 = math.exp %123 : vector<16x1xf32>
    %cst_38 = arith.constant 1.000000e+00 : f32
    %125 = vector.broadcast %cst_38 : f32 to vector<16x1xf32>
    %126 = arith.addf %125, %124 : vector<16x1xf32>
    %127 = arith.divf %125, %126 : vector<16x1xf32>
    %128 = vector.extract_strided_slice %51 {offsets = [0, 384], sizes = [16, 384], strides = [1, 1]} : vector<16x768xf32> to vector<16x384xf32>
    %129 = vector.broadcast %127 : vector<16x1xf32> to vector<16x384xf32>
    %130 = arith.mulf %128, %129 : vector<16x384xf32>
    %c0_39 = arith.constant 0 : index
    %c384 = arith.constant 384 : index
    %131 = vector.load %arg4[%c0_39, %c384] : memref<16x768xf32, #tpu.memory_space<vmem>>, vector<16x384xf32>
    tpu.vector_store %arg4[%c0_39, %c384], %130 {strides = array<i32>} : memref<16x768xf32, #tpu.memory_space<vmem>>, vector<16x384xf32>,
    return
  }
  func.func @transform_0(%arg0: i32) -> (i32, i32) {
    %c0_i32 = arith.constant 0 : i32
    %c0_i32_0 = arith.constant 0 : i32
    %c0_i32_1 = arith.constant 0 : i32
    return %c0_i32, %c0_i32_0 : i32, i32
  }
  func.func @transform_1(%arg0: i32) -> (i32, i32) {
    %c0_i32 = arith.constant 0 : i32
    %c0_i32_0 = arith.constant 0 : i32
    %c0_i32_1 = arith.constant 0 : i32
    return %c0_i32, %c0_i32_0 : i32, i32
  }
  func.func @transform_2(%arg0: i32) -> (i32, i32) {
    %c0_i32 = arith.constant 0 : i32
    %c0_i32_0 = arith.constant 0 : i32
    %c0_i32_1 = arith.constant 0 : i32
    return %c0_i32, %c0_i32_0 : i32, i32
  }
  func.func @transform_3(%arg0: i32) -> (i32, i32) {
    %c0_i32 = arith.constant 0 : i32
    %c0_i32_0 = arith.constant 0 : i32
    %c0_i32_1 = arith.constant 0 : i32
    return %c0_i32, %c0_i32_0 : i32, i32
  }
}

</mosaic_0001>

<bundles_post_ra>
// kernel: cfs_forward.1
= control target key start
LH: loop header
LB: loop body
LE: loop exit
PB: predicated region body
PF: predicated region fallthrough
CT: control target
= control target key end

     0   :  { %s1450_s16 = smov 90   ;;  %s1451_s19 = smov 91   ;;  %v1457_v3 = vmov 0.0   ;;  %v1459_v7 = vmov 0   ;;  %v42_v9 = vlaneseq  ;;  %vm184_vm8 = vcmask 588800   ;;  %s2475_s0 = inlined_call_operand.vmem [shape: f32[8,768], index: 0, kind: input, shape index: {}]   ;;  %s2476_s2 = inlined_call_operand.vmem [shape: f32[40,4], index: 2, kind: input, shape index: {}]   ;;  %s2477_s1 = inlined_call_operand.vmem [shape: f32[40,72], index: 1, kind: input, shape index: {}]   ;;  %s2478_s3 = inlined_call_operand.vmem [shape: f32[16,768], index: 3, kind: output, shape index: {}]  }
   0x1   :  { %v1486_v0 = vld [vmem:[%s2475_s0 + $0x8] sm:$0xff]  ;;  %v1491_v1 = vld [vmem:[%s2475_s0] sm:$0xff]  ;;  %v1500_v2 = vld [vmem:[%s2475_s0 + $0x10] sm:$0xff]  ;;  %s1452_s20 = smov 92   ;;  %s1453_s21 = smov 108   ;;  %258 = vmatprep.mubr.f32.mxu0 %v1457_v3  ;;  %341 = vmatprep.mubr.f32.mxu1 %v1457_v3 }
   0x2   :  { %167 = vrot.lane.b32.xlu0 %v1486_v0, %s1450_s16  ;;  %165 = vrot.lane.b32.xlu1 %v1491_v1, %s1450_s16  ;;  %s1454_s22 = smov 109   ;;  %s1455_s23 = smov 110   ;;  %v1551_v4 = vld [vmem:[%s2475_s0 + $0x28] sm:$0xff]  ;;  %v1556_v5 = vld [vmem:[%s2475_s0 + $0x18] sm:$0xff]  ;;  %v1615_v10 = vand.u32 127, %v42_v9 }
   0x3   :  { %s1456_s24 = smov 126   ;;  %s1458_s25 = smov 127   ;;  %v1565_v6 = vld [vmem:[%s2475_s0 + $0x20] sm:$0xff]  ;;  %1356 = vset.pattern.permute.xlu0 %v1459_v7  ;;  %1357 = vset.pattern.permute.xlu1 %v1459_v7  ;;  %v1728_v60 = vld [vmem:[%s2477_s1 + $0x8] sm:$0xff] }
   0x4   :  { %v25_v8 = vld [vmem:[%s2476_s2] sm:$0xff]  ;;  %vm177_vm0 = vcmp.lt.s32.totalorder %v1615_v10, 90  ;;  %vm158_vm1 = vcmp.lt.s32.totalorder %v1615_v10, 91  ;;  %vm139_vm2 = vcmp.lt.s32.totalorder %v1615_v10, 92  ;;  %vm120_vm3 = vcmp.lt.s32.totalorder %v1615_v10, 108  ;;  %s1460_s12 = smov 19  }
   0x5   :  { %vm101_vm4 = vcmp.lt.s32.totalorder %v1615_v10, 109  ;;  %vm82_vm5 = vcmp.lt.s32.totalorder %v1615_v10, 110  ;;  %vm63_vm6 = vcmp.lt.s32.totalorder %v1615_v10, 126  ;;  %vm44_vm7 = vcmp.lt.s32.totalorder %v1615_v10, 127  ;;  %v1708_v51 = vld [vmem:[%s2477_s1] sm:$0xff]  ;;  %s1461_s27 = smov 1  }
   0x6   :  { %169 = vrot.lane.b32.xlu0 %v1500_v2, %s1450_s16  ;;  %148 = vrot.lane.b32.xlu1 %v1486_v0, %s1451_s19  ;;  %vm466_vm9 = vcmp.lt.s32.totalorder %v1615_v10, 19 }
   0xa   :  { %150 = vrot.lane.b32.xlu0 %v1500_v2, %s1451_s19  ;;  %146 = vrot.lane.b32.xlu1 %v1491_v1, %s1451_s19 }
   0xe   :  { %129 = vrot.lane.b32.xlu0 %v1486_v0, %s1452_s20  ;;  %131 = vrot.lane.b32.xlu1 %v1500_v2, %s1452_s20 }
  0x12   :  { %127 = vrot.lane.b32.xlu0 %v1491_v1, %s1452_s20  ;;  %110 = vrot.lane.b32.xlu1 %v1486_v0, %s1453_s21 }
  0x16   :  { %112 = vrot.lane.b32.xlu0 %v1500_v2, %s1453_s21  ;;  %108 = vrot.lane.b32.xlu1 %v1491_v1, %s1453_s21 }
  0x1a   :  { %91 = vrot.lane.b32.xlu0 %v1486_v0, %s1454_s22  ;;  %93 = vrot.lane.b32.xlu1 %v1500_v2, %s1454_s22 }
  0x1e   :  { %89 = vrot.lane.b32.xlu0 %v1491_v1, %s1454_s22  ;;  %72 = vrot.lane.b32.xlu1 %v1486_v0, %s1455_s23 }
  0x22   :  { %74 = vrot.lane.b32.xlu0 %v1500_v2, %s1455_s23  ;;  %70 = vrot.lane.b32.xlu1 %v1491_v1, %s1455_s23 }
  0x26   :  { %53 = vrot.lane.b32.xlu0 %v1486_v0, %s1456_s24  ;;  %55 = vrot.lane.b32.xlu1 %v1500_v2, %s1456_s24 }
  0x2a   :  { %51 = vrot.lane.b32.xlu0 %v1491_v1, %s1456_s24  ;;  %32 = vrot.lane.b32.xlu1 %v1486_v0, %s1458_s25 }
  0x2e   :  { %34 = vrot.lane.b32.xlu0 %v1500_v2, %s1458_s25  ;;  %30 = vrot.lane.b32.xlu1 %v1491_v1, %s1458_s25 }
  0x32   :  { %175 = vrot.lane.b32.xlu0 %v1551_v4, %s1450_s16  ;;  %171 = vrot.lane.b32.xlu1 %v1556_v5, %s1450_s16 }
  0x36   :  { %173 = vrot.lane.b32.xlu0 %v1565_v6, %s1450_s16  ;;  %156 = vrot.lane.b32.xlu1 %v1551_v4, %s1451_s19 }
  0x3a   :  { %152 = vrot.lane.b32.xlu0 %v1556_v5, %s1451_s19  ;;  %154 = vrot.lane.b32.xlu1 %v1565_v6, %s1451_s19 }
  0x3e   :  { %137 = vrot.lane.b32.xlu0 %v1551_v4, %s1452_s20  ;;  %133 = vrot.lane.b32.xlu1 %v1556_v5, %s1452_s20 }
  0x42   :  { %135 = vrot.lane.b32.xlu0 %v1565_v6, %s1452_s20  ;;  %118 = vrot.lane.b32.xlu1 %v1551_v4, %s1453_s21 }
  0x46   :  { %114 = vrot.lane.b32.xlu0 %v1556_v5, %s1453_s21  ;;  %116 = vrot.lane.b32.xlu1 %v1565_v6, %s1453_s21 }
  0x4a   :  { %99 = vrot.lane.b32.xlu0 %v1551_v4, %s1454_s22  ;;  %95 = vrot.lane.b32.xlu1 %v1556_v5, %s1454_s22 }
  0x4e   :  { %97 = vrot.lane.b32.xlu0 %v1565_v6, %s1454_s22  ;;  %80 = vrot.lane.b32.xlu1 %v1551_v4, %s1455_s23 }
  0x52   :  { %76 = vrot.lane.b32.xlu0 %v1556_v5, %s1455_s23  ;;  %78 = vrot.lane.b32.xlu1 %v1565_v6, %s1455_s23 }
  0x56   :  { %61 = vrot.lane.b32.xlu0 %v1551_v4, %s1456_s24  ;;  %57 = vrot.lane.b32.xlu1 %v1556_v5, %s1456_s24 }
  0x5a   :  { %59 = vrot.lane.b32.xlu0 %v1565_v6, %s1456_s24  ;;  %40 = vrot.lane.b32.xlu1 %v1551_v4, %s1458_s25 }
  0x5e   :  { %36 = vrot.lane.b32.xlu0 %v1556_v5, %s1458_s25  ;;  %38 = vrot.lane.b32.xlu1 %v1565_v6, %s1458_s25 }
  0x62   :  { %445 = vperm.xlu0 %1356, %v25_v8  }
  0x74   :  { %v168_v11 = vpop.permute.xlu0 %167  ;;  %v1617_v12 = vpop.permute.xlu1 %165 }
  0x75   :  { %v182_v16 = vsel %vm177_vm0, %v1617_v12, %v168_v11 }
  0x78   :  { %v1620_v13 = vpop.permute.xlu0 %169  ;;  %v149_v14 = vpop.permute.xlu1 %148 }
  0x79   :  { %v181_v15 = vsel %vm177_vm0, %v168_v11, %v1620_v13 }
  0x7a   :  { %208 = vmatprep.subr.mxu0 %v181_v15 }
  0x7b   :  { %209 = vmatpush1.msra.mxu0 %v182_v16 }
  0x7c   :  { %v1629_v17 = vpop.permute.xlu0 %150  ;;  %v1631_v18 = vpop.permute.xlu1 %146 }
  0x7d   :  { %v162_v19 = vsel %vm158_vm1, %v149_v14, %v1629_v17  ;;  %v163_v20 = vsel %vm158_vm1, %v1631_v18, %v149_v14 }
  0x7e   :  { %210 = vmatprep.subr.mxu0 %v162_v19 }
  0x7f   :  { %211 = vmatpush1.msra.mxu0 %v163_v20 }
  0x80   :  { %v130_v21 = vpop.permute.xlu0 %129  ;;  %v1640_v22 = vpop.permute.xlu1 %131 }
  0x81   :  { %v143_v23 = vsel %vm139_vm2, %v130_v21, %v1640_v22 }
  0x82   :  { %212 = vmatprep.subr.mxu0 %v143_v23 }
  0x84   :  { %v1645_v24 = vpop.permute.xlu0 %127  ;;  %v111_v25 = vpop.permute.xlu1 %110 }
  0x85   :  { %v144_v26 = vsel %vm139_vm2, %v1645_v24, %v130_v21 }
  0x86   :  { %213 = vmatpush1.msra.mxu0 %v144_v26 }
  0x88   :  { %v1651_v27 = vpop.permute.xlu0 %112  ;;  %v1653_v28 = vpop.permute.xlu1 %108 }
  0x89   :  { %v124_v29 = vsel %vm120_vm3, %v111_v25, %v1651_v27  ;;  %v125_v30 = vsel %vm120_vm3, %v1653_v28, %v111_v25 }
  0x8a   :  { %214 = vmatprep.subr.mxu0 %v124_v29 }
  0x8b   :  { %215 = vmatpush1.msra.mxu0 %v125_v30 }
  0x8c   :  { %v92_v31 = vpop.permute.xlu0 %91  ;;  %v1662_v32 = vpop.permute.xlu1 %93 }
  0x8d   :  { %v105_v33 = vsel %vm101_vm4, %v92_v31, %v1662_v32 }
  0x8e   :  { %216 = vmatprep.subr.mxu0 %v105_v33 }
  0x90   :  { %v1667_v34 = vpop.permute.xlu0 %89  ;;  %v73_v35 = vpop.permute.xlu1 %72 }
  0x91   :  { %v106_v36 = vsel %vm101_vm4, %v1667_v34, %v92_v31 }
  0x92   :  { %217 = vmatpush1.msra.mxu0 %v106_v36 }
  0x94   :  { %v1673_v37 = vpop.permute.xlu0 %74  ;;  %v1675_v38 = vpop.permute.xlu1 %70 }
  0x95   :  { %v86_v39 = vsel %vm82_vm5, %v73_v35, %v1673_v37  ;;  %v87_v40 = vsel %vm82_vm5, %v1675_v38, %v73_v35 }
  0x96   :  { %218 = vmatprep.subr.mxu0 %v86_v39 }
  0x97   :  { %219 = vmatpush1.msra.mxu0 %v87_v40 }
  0x98   :  { %v54_v41 = vpop.permute.xlu0 %53  ;;  %v1684_v42 = vpop.permute.xlu1 %55 }
  0x99   :  { %v67_v43 = vsel %vm63_vm6, %v54_v41, %v1684_v42 }
  0x9a   :  { %220 = vmatprep.subr.mxu0 %v67_v43 }
  0x9c   :  { %v1689_v44 = vpop.permute.xlu0 %51  ;;  %v33_v45 = vpop.permute.xlu1 %32 }
  0x9d   :  { %v68_v46 = vsel %vm63_vm6, %v1689_v44, %v54_v41 }
  0x9e   :  { %221 = vmatpush1.msra.mxu0 %v68_v46 }
  0xa0   :  { %v1695_v47 = vpop.permute.xlu0 %34  ;;  %v1697_v48 = vpop.permute.xlu1 %30 }
  0xa1   :  { %v48_v49 = vsel %vm44_vm7, %v33_v45, %v1695_v47  ;;  %v49_v50 = vsel %vm44_vm7, %v1697_v48, %v33_v45 }
  0xa2   :  { %222 = vmatprep.subr.mxu0 %v48_v49 }
  0xa3   :  { %223 = vmatpush1.msra.mxu0 %v49_v50 }
  0xa4   :  { %v176_v52 = vpop.permute.xlu0 %175  ;;  %224 = vmatprep.subr.mxu0 %v1486_v0  ;;  %v172_v53 = vpop.permute.xlu1 %171 }
  0xa5   :  { %225 = vmatpush1.msra.mxu0 %v1491_v1  ;;  %v183_v54 = vsel %vm177_vm0, %v176_v52, %v1617_v12  ;;  %v180_v61 = vsel %vm177_vm0, %v1620_v13, %v172_v53  ;;  %v1746_v12 = vld [vmem:[%s2477_s1 + $0x10] sm:$0xff] }
  0xa6   :  { %374 = vmatprep.subr.mxu0 %v183_v54  ;;  %1306 = vmatmul.mubr.msk.f32.vlgmr.msra.gmra.mxu0 %vm184_vm8, %v1708_v51 }
  0xa7   :  { %264 = vmatprep.mubr.f32.mxu0 %v1457_v3 }
  0xa8   :  { %v174_v55 = vpop.permute.xlu0 %173  ;;  %v157_v56 = vpop.permute.xlu1 %156 }
  0xa9   :  { %v178_v57 = vsel %vm177_vm0, %v174_v55, %v176_v52  ;;  %v179_v58 = vsel %vm177_vm0, %v172_v53, %v174_v55  ;;  %v164_v59 = vsel %vm158_vm1, %v157_v56, %v1631_v18 }
  0xaa   :  { %291 = vmatprep.subr.mxu1 %v179_v58  ;;  %375 = vmatpush1.msra.mxu0 %v178_v57 }
  0xab   :  { %292 = vmatpush1.msra.mxu1 %v180_v61  ;;  %376 = vmatprep.subr.mxu0 %v164_v59 }
  0xac   :  { %v153_v62 = vpop.permute.xlu0 %152  ;;  %v155_v63 = vpop.permute.xlu1 %154  ;;  %1307 = vmatmul.mubr.msk.f32.gmra.mxu0 %vm184_vm8, %v1728_v60 }
  0xad   :  { %v159_v7 = vsel %vm158_vm1, %v155_v63, %v157_v56  ;;  %v160_v8 = vsel %vm158_vm1, %v153_v62, %v155_v63  ;;  %v161_v11 = vsel %vm158_vm1, %v1629_v17, %v153_v62  ;;  %270 = vmatprep.mubr.f32.mxu0 %v1457_v3 }
  0xae   :  { %293 = vmatprep.subr.mxu1 %v160_v8  ;;  %377 = vmatpush1.msra.mxu0 %v159_v7 }
  0xaf   :  { %294 = vmatpush1.msra.mxu1 %v161_v11 }
  0xb0   :  { %v138_v13 = vpop.permute.xlu0 %137  ;;  %v134_v14 = vpop.permute.xlu1 %133  ;;  %1308 = vmatmul.mubr.msk.f32.gmra.mxu0 %vm184_vm8, %v1746_v12 }
  0xb1   :  { %v145_v15 = vsel %vm139_vm2, %v138_v13, %v1645_v24  ;;  %424 = vmatprep.mubr.f32.mxu0 %v1457_v3  ;;  %v142_v21 = vsel %vm139_vm2, %v1640_v22, %v134_v14 }
  0xb2   :  { %378 = vmatprep.subr.mxu0 %v145_v15 }
  0xb4   :  { %v136_v16 = vpop.permute.xlu0 %135  ;;  %v119_v17 = vpop.permute.xlu1 %118 }
  0xb5   :  { %v140_v18 = vsel %vm139_vm2, %v136_v16, %v138_v13  ;;  %v141_v19 = vsel %vm139_vm2, %v134_v14, %v136_v16  ;;  %v126_v20 = vsel %vm120_vm3, %v119_v17, %v1653_v28 }
  0xb6   :  { %295 = vmatprep.subr.mxu1 %v141_v19  ;;  %379 = vmatpush1.msra.mxu0 %v140_v18 }
  0xb7   :  { %296 = vmatpush1.msra.mxu1 %v142_v21  ;;  %380 = vmatprep.subr.mxu0 %v126_v20 }
  0xb8   :  { %v115_v23 = vpop.permute.xlu0 %114  ;;  %v117_v24 = vpop.permute.xlu1 %116 }
  0xb9   :  { %v121_v25 = vsel %vm120_vm3, %v117_v24, %v119_v17  ;;  %v122_v26 = vsel %vm120_vm3, %v115_v23, %v117_v24  ;;  %v123_v28 = vsel %vm120_vm3, %v1651_v27, %v115_v23 }
  0xba   :  { %297 = vmatprep.subr.mxu1 %v122_v26  ;;  %381 = vmatpush1.msra.mxu0 %v121_v25 }
  0xbb   :  { %298 = vmatpush1.msra.mxu1 %v123_v28 }
  0xbc   :  { %v100_v29 = vpop.permute.xlu0 %99  ;;  %v96_v30 = vpop.permute.xlu1 %95 }
  0xbd   :  { %v107_v22 = vsel %vm101_vm4, %v100_v29, %v1667_v34  ;;  %v104_v39 = vsel %vm101_vm4, %v1662_v32, %v96_v30 }
  0xbe   :  { %382 = vmatprep.subr.mxu0 %v107_v22 }
  0xc0   :  { %v98_v31 = vpop.permute.xlu0 %97  ;;  %v81_v33 = vpop.permute.xlu1 %80 }
  0xc1   :  { %v102_v35 = vsel %vm101_vm4, %v98_v31, %v100_v29  ;;  %v103_v36 = vsel %vm101_vm4, %v96_v30, %v98_v31  ;;  %v88_v27 = vsel %vm82_vm5, %v81_v33, %v1675_v38 }
  0xc2   :  { %299 = vmatprep.subr.mxu1 %v103_v36  ;;  %383 = vmatpush1.msra.mxu0 %v102_v35 }
  0xc3   :  { %300 = vmatpush1.msra.mxu1 %v104_v39  ;;  %384 = vmatprep.subr.mxu0 %v88_v27 }
  0xc4   :  { %v77_v34 = vpop.permute.xlu0 %76  ;;  %v79_v40 = vpop.permute.xlu1 %78 }
  0xc5   :  { %v83_v41 = vsel %vm82_vm5, %v79_v40, %v81_v33  ;;  %v84_v43 = vsel %vm82_vm5, %v77_v34, %v79_v40  ;;  %v85_v38 = vsel %vm82_vm5, %v1673_v37, %v77_v34 }
  0xc6   :  { %301 = vmatprep.subr.mxu1 %v84_v43  ;;  %385 = vmatpush1.msra.mxu0 %v83_v41 }
  0xc7   :  { %302 = vmatpush1.msra.mxu1 %v85_v38 }
  0xc8   :  { %v62_v45 = vpop.permute.xlu0 %61  ;;  %v58_v46 = vpop.permute.xlu1 %57 }
  0xc9   :  { %v69_v32 = vsel %vm63_vm6, %v62_v45, %v1689_v44  ;;  %v66_v54 = vsel %vm63_vm6, %v1684_v42, %v58_v46 }
  0xca   :  { %386 = vmatprep.subr.mxu0 %v69_v32 }
  0xcc   :  { %v60_v49 = vpop.permute.xlu0 %59  ;;  %v41_v50 = vpop.permute.xlu1 %40 }
  0xcd   :  { %v64_v52 = vsel %vm63_vm6, %v60_v49, %v62_v45  ;;  %v65_v53 = vsel %vm63_vm6, %v58_v46, %v60_v49  ;;  %v50_v37 = vsel %vm44_vm7, %v41_v50, %v1697_v48 }
  0xce   :  { %303 = vmatprep.subr.mxu1 %v65_v53  ;;  %387 = vmatpush1.msra.mxu0 %v64_v52 }
  0xcf   :  { %304 = vmatpush1.msra.mxu1 %v66_v54  ;;  %388 = vmatprep.subr.mxu0 %v50_v37 }
  0xd0   :  { %v37_v44 = vpop.permute.xlu0 %36  ;;  %v39_v55 = vpop.permute.xlu1 %38 }
  0xd1   :  { %v45_v56 = vsel %vm44_vm7, %v39_v55, %v41_v50  ;;  %v46_v57 = vsel %vm44_vm7, %v37_v44, %v39_v55  ;;  %v47_v48 = vsel %vm44_vm7, %v1695_v47, %v37_v44 }
  0xd2   :  { %305 = vmatprep.subr.mxu1 %v46_v57  ;;  %389 = vmatpush1.msra.mxu0 %v45_v56 }
  0xd3   :  { %306 = vmatpush1.msra.mxu1 %v47_v48  ;;  %390 = vmatprep.subr.mxu0 %v1551_v4  ;;  %v1977_v48 = vld [vmem:[%s2476_s2 + $0x10] sm:$0xff] }
  0xd4   :  { %307 = vmatprep.subr.mxu1 %v1556_v5  ;;  %391 = vmatpush1.msra.mxu0 %v1565_v6 }
  0xd5   :  { %308 = vmatpush1.msra.mxu1 %v1500_v2  ;;  %1312 = vmatmul.mubr.msk.f32.vlgmr.msra.gmra.mxu0 %vm184_vm8, %v1708_v51 }
  0xd6   :  { %1309 = vmatmul.mubr.msk.f32.vlgmr.msra.gmra.mxu1 %vm184_vm8, %v1708_v51  ;;  %430 = vmatprep.mubr.f32.mxu0 %v1457_v3 }
  0xd7   :  { %347 = vmatprep.mubr.f32.mxu1 %v1457_v3 }
  0xd9   :  { %1313 = vmatmul.mubr.msk.f32.gmra.mxu0 %vm184_vm8, %v1728_v60 }
  0xda   :  { %1310 = vmatmul.mubr.msk.f32.gmra.mxu1 %vm184_vm8, %v1728_v60  ;;  %436 = vmatprep.mubr.f32.mxu0 %v1457_v3 }
  0xdb   :  { %353 = vmatprep.mubr.f32.mxu1 %v1457_v3 }
  0xdd   :  { %1314 = vmatmul.mubr.msk.f32.gmra.mxu0 %vm184_vm8, %v1746_v12  ;;  %v446_v42 = vpop.permute.xlu0 %445 }
  0xde   :  { %1311 = vmatmul.mubr.msk.f32.gmra.mxu1 %vm184_vm8, %v1746_v12  ;;  %816 = vmatprep.mubr.f32.mxu0 %v1457_v3 }
  0xdf   :  { %739 = vmatprep.mubr.f32.mxu1 %v1457_v3 }
 0x166   :  { %v260_v47 = vpop.f32.mrf.mxu0 }
 0x167   :  { %v448_v51 = vadd.f32 %v446_v42, %v260_v47 }
 0x168   :  { %v262_v58 = vpop.f32.mrf.mxu0 }
 0x169   :  { %454 = vrot.lane.b32.xlu1 %v448_v51, %s1460_s12  ;;  %v449_v59 = vadd.f32 %v446_v42, %v262_v58 }
 0x16c   :  { %v1833_v60 = vpop.f32.mrf.mxu0 }
 0x16d   :  { %456 = vrot.lane.b32.xlu1 %v449_v59, %s1460_s12 }
 0x16e   :  { %v1835_v61 = vpop.f32.mrf.mxu0 }
 0x170   :  { %v1837_v62 = vpop.f32.mrf.mxu0 }
 0x172   :  { %v1839_v63 = vpop.f32.mrf.mxu0 }
 0x195   :  { %v426_v7 = vpop.f32.mrf.mxu0 }
 0x196   :  { %v343_v8 = vpop.f32.mrf.mxu1  ;;  %v452_v16 = vadd.f32 %v446_v42, %v426_v7  ;;  %v29_v7 = vld [vmem:[%s2476_s2 + $0x20] sm:$0xff] }
 0x197   :  { %v450_v11 = vadd.f32 %v446_v42, %v343_v8  ;;  %v428_v12 = vpop.f32.mrf.mxu0 }
 0x198   :  { %v453_v13 = vadd.f32 %v446_v42, %v428_v12  ;;  %v345_v14 = vpop.f32.mrf.mxu1 }
 0x199   :  { %458 = vrot.lane.b32.xlu0 %v450_v11, %s1460_s12  ;;  %v451_v15 = vadd.f32 %v446_v42, %v345_v14  ;;  %v28_v42 = vld [vmem:[%s2476_s2 + $0x18] sm:$0xff] }
 0x19a   :  { %464 = vrot.lane.b32.xlu1 %v453_v13, %s1460_s12 }
 0x19d   :  { %460 = vrot.lane.b32.xlu0 %v451_v15, %s1460_s12 }
 0x19e   :  { %462 = vrot.lane.b32.xlu1 %v452_v16, %s1460_s12 }
 0x1db   :  { %v455_v17 = vpop.permute.xlu1 %454 }
 0x1df   :  { %v457_v18 = vpop.permute.xlu1 %456 }
 0x1e0   :  { %v471_v19 = vsel %vm466_vm9, %v455_v17, %v457_v18 }
 0x1e1   :  { %v1316_v20 = vmul.f32 -1.442695, %v471_v19 }
 0x1e3   :  { %1360 = vpow2.f32 %v1316_v20 }
 0x1f0   :  { %v1361_v21 = vpop.eup %1360 }
 0x1f1   :  { %v492_v23 = vadd.f32 1.0, %v1361_v21 }
 0x1f3   :  { %1362 = vrcp.f32 %v492_v23 }
 0x200   :  { %v1363_v24 = vpop.eup %1362 }
 0x201   :  { %v1845_v25 = vmul.f32 %v1363_v24, %v1486_v0 }
 0x203   :  { %643 = vrot.lane.b32.xlu0 %v1845_v25, %s1450_s16 }
 0x20b   :  { %v459_v26 = vpop.permute.xlu0 %458 }
 0x20c   :  { %v470_v28 = vsel %vm466_vm9, %v457_v18, %v459_v26  ;;  %v465_v29 = vpop.permute.xlu1 %464 }
 0x20d   :  { %v1317_v30 = vmul.f32 -1.442695, %v470_v28  ;;  %v472_v22 = vsel %vm466_vm9, %v465_v29, %v455_v17 }
 0x20f   :  { %1364 = vpow2.f32 %v1317_v30  ;;  %v461_v31 = vpop.permute.xlu0 %460 }
 0x210   :  { %v469_v0 = vsel %vm466_vm9, %v459_v26, %v461_v31  ;;  %v463_v27 = vpop.permute.xlu1 %462 }
 0x211   :  { %v1318_v36 = vmul.f32 -1.442695, %v469_v0  ;;  %v468_v40 = vsel %vm466_vm9, %v461_v31, %v463_v27  ;;  %v467_v50 = vsel %vm466_vm9, %v463_v27, %v465_v29 }
 0x212   :  { %v1319_v41 = vmul.f32 -1.442695, %v468_v40  ;;  %v1320_v53 = vmul.f32 -1.442695, %v467_v50 }
 0x21c   :  { %v1365_v33 = vpop.eup %1364 }
 0x21d   :  { %v493_v35 = vadd.f32 1.0, %v1365_v33 }
 0x21f   :  { %1366 = vrcp.f32 %v493_v35 }
 0x220   :  { %1368 = vpow2.f32 %v1318_v36 }
 0x221   :  { %1370 = vpow2.f32 %v1319_v41 }
 0x22c   :  { %v1367_v39 = vpop.eup %1366 }
 0x22d   :  { %v1856_v34 = vmul.f32 %v1367_v39, %v1500_v2  ;;  %v1369_v43 = vpop.eup %1368  ;;  %v1315_v2 = vmul.f32 -1.442695, %v472_v22 }
 0x22e   :  { %v494_v38 = vadd.f32 1.0, %v1369_v43  ;;  %v1371_v45 = vpop.eup %1370 }
 0x22f   :  { %627 = vrot.lane.b32.xlu0 %v1856_v34, %s1451_s19  ;;  %645 = vrot.lane.b32.xlu1 %v1856_v34, %s1450_s16  ;;  %v495_v46 = vadd.f32 1.0, %v1371_v45 }
 0x230   :  { %1372 = vrcp.f32 %v494_v38 }
 0x231   :  { %1374 = vpow2.f32 %v1315_v2 }
 0x232   :  { %1376 = vrcp.f32 %v495_v46 }
 0x233   :  { %607 = vrot.lane.b32.xlu0 %v1845_v25, %s1452_s20  ;;  %625 = vrot.lane.b32.xlu1 %v1845_v25, %s1451_s19  ;;  %1378 = vpow2.f32 %v1320_v53 }
 0x237   :  { %591 = vrot.lane.b32.xlu0 %v1856_v34, %s1453_s21  ;;  %609 = vrot.lane.b32.xlu1 %v1856_v34, %s1452_s20 }
 0x23b   :  { %571 = vrot.lane.b32.xlu0 %v1845_v25, %s1454_s22  ;;  %589 = vrot.lane.b32.xlu1 %v1845_v25, %s1453_s21 }
 0x23d   :  { %v1373_v32 = vpop.eup %1372 }
 0x23e   :  { %v1889_v49 = vmul.f32 %v1373_v32, %v1556_v5  ;;  %v1375_v52 = vpop.eup %1374 }
 0x23f   :  { %555 = vrot.lane.b32.xlu0 %v1856_v34, %s1455_s23  ;;  %573 = vrot.lane.b32.xlu1 %v1856_v34, %s1454_s22  ;;  %v491_v5 = vadd.f32 1.0, %v1375_v52  ;;  %v1377_v37 = vpop.eup %1376 }
 0x240   :  { %v1910_v54 = vmul.f32 %v1377_v37, %v1565_v6  ;;  %v1379_v44 = vpop.eup %1378 }
 0x241   :  { %1380 = vrcp.f32 %v491_v5  ;;  %v496_v56 = vadd.f32 1.0, %v1379_v44 }
 0x243   :  { %535 = vrot.lane.b32.xlu0 %v1845_v25, %s1456_s24  ;;  %553 = vrot.lane.b32.xlu1 %v1845_v25, %s1455_s23  ;;  %1382 = vrcp.f32 %v496_v56 }
 0x247   :  { %519 = vrot.lane.b32.xlu0 %v1856_v34, %s1458_s25  ;;  %537 = vrot.lane.b32.xlu1 %v1856_v34, %s1456_s24 }
 0x24b   :  { %647 = vrot.lane.b32.xlu0 %v1889_v49, %s1450_s16  ;;  %517 = vrot.lane.b32.xlu1 %v1845_v25, %s1458_s25 }
 0x24e   :  { %v1381_v55 = vpop.eup %1380 }
 0x24f   :  { %629 = vrot.lane.b32.xlu0 %v1889_v49, %s1451_s19  ;;  %611 = vrot.lane.b32.xlu1 %v1889_v49, %s1452_s20  ;;  %v1925_v6 = vmul.f32 %v1381_v55, %v1491_v1 }
 0x250   :  { %v1383_v1 = vpop.eup %1382 }
 0x251   :  { %v1948_v57 = vmul.f32 %v1383_v1, %v1551_v4  ;;  %v1969_v4 = vld [vmem:[%s2476_s2 + $0x8] sm:$0xff] }
 0x253   :  { %593 = vrot.lane.b32.xlu0 %v1889_v49, %s1453_s21  ;;  %575 = vrot.lane.b32.xlu1 %v1889_v49, %s1454_s22 }
 0x257   :  { %557 = vrot.lane.b32.xlu0 %v1889_v49, %s1455_s23  ;;  %539 = vrot.lane.b32.xlu1 %v1889_v49, %s1456_s24 }
 0x25b   :  { %613 = vrot.lane.b32.xlu0 %v1910_v54, %s1452_s20  ;;  %649 = vrot.lane.b32.xlu1 %v1910_v54, %s1450_s16 }
 0x25f   :  { %577 = vrot.lane.b32.xlu0 %v1910_v54, %s1454_s22  ;;  %631 = vrot.lane.b32.xlu1 %v1910_v54, %s1451_s19 }
 0x263   :  { %541 = vrot.lane.b32.xlu0 %v1910_v54, %s1456_s24  ;;  %595 = vrot.lane.b32.xlu1 %v1910_v54, %s1453_s21 }
 0x267   :  { %641 = vrot.lane.b32.xlu0 %v1925_v6, %s1450_s16  ;;  %559 = vrot.lane.b32.xlu1 %v1910_v54, %s1455_s23 }
 0x26b   :  { %605 = vrot.lane.b32.xlu0 %v1925_v6, %s1452_s20  ;;  %623 = vrot.lane.b32.xlu1 %v1925_v6, %s1451_s19 }
 0x26f   :  { %569 = vrot.lane.b32.xlu0 %v1925_v6, %s1454_s22  ;;  %587 = vrot.lane.b32.xlu1 %v1925_v6, %s1453_s21 }
 0x273   :  { %533 = vrot.lane.b32.xlu0 %v1925_v6, %s1456_s24  ;;  %551 = vrot.lane.b32.xlu1 %v1925_v6, %s1455_s23 }
 0x275   :  { %v644_v47 = vpop.permute.xlu0 %643 }
 0x277   :  { %521 = vrot.lane.b32.xlu0 %v1889_v49, %s1458_s25  ;;  %515 = vrot.lane.b32.xlu1 %v1925_v6, %s1458_s25 }
 0x27b   :  { %523 = vrot.lane.b32.xlu1 %v1910_v54, %s1458_s25  ;;  %651 = vrot.lane.b32.xlu0 %v1948_v57, %s1450_s16 }
 0x27f   :  { %633 = vrot.lane.b32.xlu1 %v1948_v57, %s1451_s19  ;;  %615 = vrot.lane.b32.xlu0 %v1948_v57, %s1452_s20 }
 0x283   :  { %597 = vrot.lane.b32.xlu1 %v1948_v57, %s1453_s21  ;;  %579 = vrot.lane.b32.xlu0 %v1948_v57, %s1454_s22 }
 0x287   :  { %561 = vrot.lane.b32.xlu1 %v1948_v57, %s1455_s23  ;;  %543 = vrot.lane.b32.xlu0 %v1948_v57, %s1456_s24 }
 0x28b   :  { %525 = vrot.lane.b32.xlu1 %v1948_v57, %s1458_s25  ;;  %908 = vperm.xlu0 %1356, %v1969_v4  }
 0x28f   :  { %913 = vperm.xlu1 %1357, %v1977_v48   ;;  %661 = vperm.xlu0 %1356, %v28_v42  }
 0x293   :  { %666 = vperm.xlu1 %1357, %v29_v7  }
 0x2a1   :  { %v628_v51 = vpop.permute.xlu0 %627  ;;  %v646_v58 = vpop.permute.xlu1 %645 }
 0x2a2   :  { %v656_v59 = vsel %vm177_vm0, %v644_v47, %v646_v58 }
 0x2a3   :  { %689 = vmatprep.subr.mxu1 %v656_v59 }
 0x2a5   :  { %v1988_v8 = vpop.permute.xlu0 %607  ;;  %v626_v11 = vpop.permute.xlu1 %625 }
 0x2a6   :  { %v638_v56 = vsel %vm158_vm1, %v626_v11, %v628_v51 }
 0x2a9   :  { %v1990_v12 = vpop.permute.xlu0 %591  ;;  %v610_v13 = vpop.permute.xlu1 %609 }
 0x2ad   :  { %v1992_v14 = vpop.permute.xlu0 %571  ;;  %v1994_v15 = vpop.permute.xlu1 %589 }
 0x2b1   :  { %v1996_v16 = vpop.permute.xlu0 %555  ;;  %v1998_v17 = vpop.permute.xlu1 %573 }
 0x2b5   :  { %v2000_v18 = vpop.permute.xlu0 %535  ;;  %v2002_v19 = vpop.permute.xlu1 %553 }
 0x2b9   :  { %v2004_v20 = vpop.permute.xlu0 %519  ;;  %v2006_v21 = vpop.permute.xlu1 %537 }
 0x2bd   :  { %v648_v23 = vpop.permute.xlu0 %647  ;;  %v2008_v24 = vpop.permute.xlu1 %517 }
 0x2be   :  { %v655_v36 = vsel %vm177_vm0, %v646_v58, %v648_v23 }
 0x2c1   :  { %v630_v26 = vpop.permute.xlu0 %629  ;;  %v612_v28 = vpop.permute.xlu1 %611 }
 0x2c2   :  { %v637_v41 = vsel %vm158_vm1, %v628_v51, %v630_v26  ;;  %v619_v38 = vsel %vm139_vm2, %v610_v13, %v612_v28  ;;  %v620_v51 = vsel %vm139_vm2, %v1988_v8, %v610_v13 }
 0x2c5   :  { %v594_v29 = vpop.permute.xlu0 %593  ;;  %v576_v30 = vpop.permute.xlu1 %575 }
 0x2c6   :  { %v601_v32 = vsel %vm120_vm3, %v1990_v12, %v594_v29  ;;  %v583_v52 = vsel %vm101_vm4, %v1998_v17, %v576_v30 }
 0x2c9   :  { %v558_v22 = vpop.permute.xlu0 %557  ;;  %v540_v31 = vpop.permute.xlu1 %539 }
 0x2ca   :  { %v565_v55 = vsel %vm82_vm5, %v1996_v16, %v558_v22  ;;  %v547_v42 = vsel %vm63_vm6, %v2006_v21, %v540_v31 }
 0x2cd   :  { %v2010_v33 = vpop.permute.xlu0 %613  ;;  %v2012_v35 = vpop.permute.xlu1 %649 }
 0x2ce   :  { %v654_v0 = vsel %vm177_vm0, %v648_v23, %v2012_v35  ;;  %v618_v43 = vsel %vm139_vm2, %v612_v28, %v2010_v33 }
 0x2cf   :  { %766 = vmatprep.subr.mxu0 %v654_v0 }
 0x2d0   :  { %767 = vmatpush1.msra.mxu0 %v655_v36 }
 0x2d1   :  { %v2019_v27 = vpop.permute.xlu0 %577  ;;  %v2021_v39 = vpop.permute.xlu1 %631 }
 0x2d2   :  { %v636_v40 = vsel %vm158_vm1, %v630_v26, %v2021_v39  ;;  %v582_v50 = vsel %vm101_vm4, %v576_v30, %v2019_v27 }
 0x2d3   :  { %768 = vmatprep.subr.mxu0 %v636_v40 }
 0x2d4   :  { %769 = vmatpush1.msra.mxu0 %v637_v41 }
 0x2d5   :  { %v2033_v2 = vpop.permute.xlu0 %541  ;;  %770 = vmatprep.subr.mxu0 %v618_v43  ;;  %v2035_v45 = vpop.permute.xlu1 %595 }
 0x2d6   :  { %771 = vmatpush1.msra.mxu0 %v619_v38  ;;  %v600_v46 = vsel %vm120_vm3, %v594_v29, %v2035_v45  ;;  %v546_v1 = vsel %vm63_vm6, %v540_v31, %v2033_v2 }
 0x2d7   :  { %772 = vmatprep.subr.mxu0 %v600_v46 }
 0x2d8   :  { %773 = vmatpush1.msra.mxu0 %v601_v32 }
 0x2d9   :  { %v642_v53 = vpop.permute.xlu0 %641  ;;  %774 = vmatprep.subr.mxu0 %v582_v50  ;;  %v2049_v5 = vpop.permute.xlu1 %559 }
 0x2da   :  { %v657_v37 = vsel %vm177_vm0, %v642_v53, %v644_v47  ;;  %775 = vmatpush1.msra.mxu0 %v583_v52  ;;  %v564_v44 = vsel %vm82_vm5, %v558_v22, %v2049_v5 }
 0x2db   :  { %690 = vmatpush1.msra.mxu1 %v657_v37  ;;  %776 = vmatprep.subr.mxu0 %v564_v44 }
 0x2dc   :  { %691 = vmatprep.subr.mxu1 %v638_v56  ;;  %777 = vmatpush1.msra.mxu0 %v565_v55 }
 0x2dd   :  { %v2067_v47 = vpop.permute.xlu0 %605  ;;  %778 = vmatprep.subr.mxu0 %v546_v1  ;;  %v624_v58 = vpop.permute.xlu1 %623  ;;  %v1041_v1 = vcvt.s32.f32 %v1615_v10 }
 0x2de   :  { %v639_v59 = vsel %vm158_vm1, %v624_v58, %v626_v11  ;;  %779 = vmatpush1.msra.mxu0 %v547_v42  ;;  %v621_v7 = vsel %vm139_vm2, %v2067_v47, %v1988_v8  ;;  %v602_v11 = vsel %vm120_vm3, %v1994_v15, %v1990_v12  ;;  %v584_v8 = vsel %vm101_vm4, %v1992_v14, %v1998_v17 }
 0x2df   :  { %692 = vmatpush1.msra.mxu1 %v639_v59  ;;  %v349_v59 = vpop.f32.mrf.mxu1 }
 0x2e0   :  { %693 = vmatprep.subr.mxu1 %v620_v51 }
 0x2e1   :  { %v2078_v23 = vpop.permute.xlu0 %569  ;;  %694 = vmatpush1.msra.mxu1 %v621_v7  ;;  %v588_v26 = vpop.permute.xlu1 %587 }
 0x2e2   :  { %v603_v28 = vsel %vm120_vm3, %v588_v26, %v1994_v15  ;;  %695 = vmatprep.subr.mxu1 %v602_v11  ;;  %v585_v13 = vsel %vm101_vm4, %v2078_v23, %v1992_v14  ;;  %v566_v15 = vsel %vm82_vm5, %v2002_v19, %v1996_v16  ;;  %v548_v14 = vsel %vm63_vm6, %v2000_v18, %v2006_v21  ;;  %v23_v21 = vld [vmem:[%s2477_s1 + $0x18] sm:$0xff] }
 0x2e3   :  { %696 = vmatpush1.msra.mxu1 %v603_v28 }
 0x2e4   :  { %697 = vmatprep.subr.mxu1 %v584_v8 }
 0x2e5   :  { %v2095_v29 = vpop.permute.xlu0 %533  ;;  %698 = vmatpush1.msra.mxu1 %v585_v13  ;;  %v552_v12 = vpop.permute.xlu1 %551 }
 0x2e6   :  { %v567_v30 = vsel %vm82_vm5, %v552_v12, %v2002_v19  ;;  %699 = vmatprep.subr.mxu1 %v566_v15  ;;  %v549_v17 = vsel %vm63_vm6, %v2095_v29, %v2000_v18  ;;  %v530_v19 = vsel %vm44_vm7, %v2008_v24, %v2004_v20 }
 0x2e7   :  { %700 = vmatpush1.msra.mxu1 %v567_v30  ;;  %v432_v30 = vpop.f32.mrf.mxu0 }
 0x2e8   :  { %701 = vmatprep.subr.mxu1 %v548_v14 }
 0x2e9   :  { %v522_v22 = vpop.permute.xlu0 %521  ;;  %702 = vmatpush1.msra.mxu1 %v549_v17  ;;  %v516_v16 = vpop.permute.xlu1 %515 }
 0x2ea   :  { %v531_v31 = vsel %vm44_vm7, %v516_v16, %v2008_v24  ;;  %703 = vmatprep.subr.mxu1 %v530_v19 }
 0x2eb   :  { %704 = vmatpush1.msra.mxu1 %v531_v31  ;;  %v2196_v31 = vadd.s32 384, %v1615_v10 }
 0x2ec   :  { %705 = vmatprep.subr.mxu1 %v1845_v25  ;;  %v529_v25 = vsel %vm44_vm7, %v2004_v20, %v522_v22 }
 0x2ed   :  { %v652_v18 = vpop.permute.xlu0 %651  ;;  %706 = vmatpush1.msra.mxu1 %v1925_v6  ;;  %v524_v0 = vpop.permute.xlu1 %523  ;;  %v24_v6 = vld [vmem:[%s2477_s1 + $0x20] sm:$0xff] }
 0x2ee   :  { %v653_v36 = vsel %vm177_vm0, %v2012_v35, %v652_v18  ;;  %1321 = vmatmul.mubr.msk.f32.vlgmr.msra.gmra.mxu1 %vm184_vm8, %v23_v21  ;;  %v528_v24 = vsel %vm44_vm7, %v522_v22, %v524_v0  ;;  %v658_v40 = vsel %vm177_vm0, %v652_v18, %v642_v53 }
 0x2ef   :  { %780 = vmatprep.subr.mxu0 %v528_v24  ;;  %843 = vmatprep.subr.mxu1 %v658_v40 }
 0x2f0   :  { %781 = vmatpush1.msra.mxu0 %v529_v25  ;;  %844 = vmatpush1.msra.mxu1 %v653_v36 }
 0x2f1   :  { %v616_v35 = vpop.permute.xlu0 %615  ;;  %745 = vmatprep.mubr.f32.mxu1 %v1457_v3  ;;  %782 = vmatprep.subr.mxu0 %v1889_v49  ;;  %v634_v41 = vpop.permute.xlu1 %633 }
 0x2f2   :  { %v635_v43 = vsel %vm158_vm1, %v2021_v39, %v634_v41  ;;  %1322 = vmatmul.mubr.msk.f32.gmra.mxu1 %vm184_vm8, %v24_v6  ;;  %783 = vmatpush1.msra.mxu0 %v1856_v34  ;;  %v640_v20 = vsel %vm158_vm1, %v634_v41, %v624_v58  ;;  %v622_v49 = vsel %vm139_vm2, %v616_v35, %v2067_v47  ;;  %v1037_v58 = vadd.s32 256, %v1615_v10 }
 0x2f3   :  { %1323 = vmatmul.mubr.msk.f32.vlgmr.msra.gmra.mxu0 %vm184_vm8, %v23_v21  ;;  %845 = vmatprep.subr.mxu1 %v640_v20  ;;  %v617_v39 = vsel %vm139_vm2, %v2010_v33, %v616_v35  ;;  %v1044_v41 = vcvt.s32.f32 %v2196_v31 }
 0x2f4   :  { %846 = vmatpush1.msra.mxu1 %v635_v43  ;;  %822 = vmatprep.mubr.f32.mxu0 %v1457_v3 }
 0x2f5   :  { %v580_v38 = vpop.permute.xlu0 %579  ;;  %847 = vmatprep.subr.mxu1 %v622_v49  ;;  %v598_v34 = vpop.permute.xlu1 %597  ;;  %893 = vmatprep.mubr.f32.mxu1 %v1457_v3 }
 0x2f6   :  { %v599_v46 = vsel %vm120_vm3, %v2035_v45, %v598_v34  ;;  %848 = vmatpush1.msra.mxu1 %v617_v39  ;;  %v604_v32 = vsel %vm120_vm3, %v598_v34, %v588_v26  ;;  %v586_v33 = vsel %vm101_vm4, %v580_v38, %v2078_v23  ;;  %v581_v50 = vsel %vm101_vm4, %v2019_v27, %v580_v38  ;;  %v351_v26 = vpop.f32.mrf.mxu1 }
 0x2f7   :  { %1324 = vmatmul.mubr.msk.f32.gmra.mxu0 %vm184_vm8, %v24_v6  ;;  %849 = vmatprep.subr.mxu1 %v604_v32  ;;  %v1043_v23 = vcvt.s32.f32 %v1037_v58  ;;  %v2200_v39 = vadd.s32 512, %v1615_v10 }
 0x2f8   :  { %850 = vmatpush1.msra.mxu1 %v599_v46 }
 0x2f9   :  { %v544_v52 = vpop.permute.xlu0 %543  ;;  %851 = vmatprep.subr.mxu1 %v586_v33  ;;  %v562_v53 = vpop.permute.xlu1 %561  ;;  %v1050_v17 = vmul.f32 0.0026041667, %v1043_v23 }
 0x2fa   :  { %v563_v45 = vsel %vm82_vm5, %v2049_v5, %v562_v53  ;;  %852 = vmatpush1.msra.mxu1 %v581_v50  ;;  %v568_v37 = vsel %vm82_vm5, %v562_v53, %v552_v12  ;;  %v550_v44 = vsel %vm63_vm6, %v544_v52, %v2095_v29  ;;  %v545_v27 = vsel %vm63_vm6, %v2033_v2, %v544_v52  ;;  %v355_v12 = vpop.f32.mrf.mxu1 }
 0x2fb   :  { %853 = vmatprep.subr.mxu1 %v568_v37  ;;  %v1036_v2 = vadd.s32 128, %v1615_v10  ;;  %v1051_v50 = vmul.f32 0.0026041667, %v1044_v41  ;;  %v2203_v52 = vadd.s32 640, %v1615_v10 }
 0x2fc   :  { %854 = vmatpush1.msra.mxu1 %v563_v45  ;;  %v357_v40 = vpop.f32.mrf.mxu1 }
 0x2fd   :  { %855 = vmatprep.subr.mxu1 %v550_v44  ;;  %v526_v55 = vpop.permute.xlu1 %525  ;;  %v1042_v47 = vcvt.s32.f32 %v1036_v2 }
 0x2fe   :  { %v527_v56 = vsel %vm44_vm7, %v524_v0, %v526_v55  ;;  %856 = vmatpush1.msra.mxu1 %v545_v27  ;;  %v532_v5 = vsel %vm44_vm7, %v526_v55, %v516_v16  ;;  %v1056_v0 = vfloor.f32 %v1050_v17  ;;  %v1045_v27 = vcvt.s32.f32 %v2200_v39 }
 0x2ff   :  { %857 = vmatprep.subr.mxu1 %v532_v5  ;;  %v1049_v7 = vmul.f32 0.0026041667, %v1042_v47 }
 0x300   :  { %858 = vmatpush1.msra.mxu1 %v527_v56  ;;  %v1062_v20 = vmul.f32 384.0, %v1056_v0 }
 0x301   :  { %859 = vmatprep.subr.mxu1 %v1948_v57  ;;  %v1048_v57 = vmul.f32 0.0026041667, %v1041_v1  ;;  %v1055_v15 = vfloor.f32 %v1049_v7 }
 0x302   :  { %860 = vmatpush1.msra.mxu1 %v1910_v54  ;;  %v1068_v37 = vsub.f32 %v1043_v23, %v1062_v20 }
 0x303   :  { %1325 = vmatmul.mubr.msk.f32.vlgmr.msra.gmra.mxu1 %vm184_vm8, %v23_v21  ;;  %v1054_v13 = vfloor.f32 %v1048_v57  ;;  %v1061_v19 = vmul.f32 384.0, %v1055_v15  ;;  %v434_v21 = vpop.f32.mrf.mxu0 }
 0x304   :  { %899 = vmatprep.mubr.f32.mxu1 %v1457_v3  ;;  %v1075_v10 = vmul.f32 0.055555556, %v1068_v37 }
 0x305   :  { %v1067_v35 = vsub.f32 %v1042_v47, %v1061_v19 }
 0x306   :  { %v909_v42 = vpop.permute.xlu0 %908 }
 0x307   :  { %1326 = vmatmul.mubr.msk.f32.gmra.mxu1 %vm184_vm8, %v24_v6  ;;  %v916_v51 = vadd.f32 %v909_v42, %v1833_v60  ;;  %v917_v54 = vadd.f32 %v909_v42, %v1835_v61  ;;  %v918_v28 = vadd.f32 %v909_v42, %v349_v59  ;;  %v1060_v61 = vmul.f32 384.0, %v1054_v13  ;;  %v438_v6 = vpop.f32.mrf.mxu0 }
 0x308   :  { %v919_v36 = vadd.f32 %v909_v42, %v351_v26  ;;  %v920_v25 = vadd.f32 %v909_v42, %v432_v30  ;;  %v921_v38 = vadd.f32 %v909_v42, %v434_v21  ;;  %v1074_v33 = vmul.f32 0.055555556, %v1067_v35 }
 0x309   :  { %v1327_v8 = vmul.f32 -1.442695, %v916_v51  ;;  %v1328_v29 = vmul.f32 -1.442695, %v917_v54  ;;  %v1329_v60 = vmul.f32 -1.442695, %v918_v28  ;;  %v440_v46 = vpop.f32.mrf.mxu0  ;;  %v1046_v42 = vcvt.s32.f32 %v2203_v52 }
 0x30a   :  { %v914_v11 = vpop.permute.xlu1 %913  ;;  %v1330_v49 = vmul.f32 -1.442695, %v919_v36  ;;  %v1331_v34 = vmul.f32 -1.442695, %v920_v25  ;;  %v1332_v55 = vmul.f32 -1.442695, %v921_v38  ;;  %v1080_v2 = vfloor.f32 %v1074_v33  ;;  %v2234_v39 = vpop.permute.xlu0 %661 }
 0x30b   :  { %v922_v14 = vadd.f32 %v914_v11, %v1837_v62  ;;  %v923_v22 = vadd.f32 %v914_v11, %v1839_v63  ;;  %1384 = vpow2.f32 %v1327_v8  ;;  %v924_v16 = vadd.f32 %v914_v11, %v355_v12 }
 0x30c   :  { %1386 = vpow2.f32 %v1328_v29  ;;  %v1066_v63 = vsub.f32 %v1041_v1, %v1060_v61  ;;  %v925_v43 = vadd.f32 %v914_v11, %v357_v40  ;;  %v926_v45 = vadd.f32 %v914_v11, %v438_v6 }
 0x30d   :  { %v1333_v18 = vmul.f32 -1.442695, %v922_v14  ;;  %v1334_v24 = vmul.f32 -1.442695, %v923_v22  ;;  %1388 = vpow2.f32 %v1329_v60  ;;  %v1335_v62 = vmul.f32 -1.442695, %v924_v16 }
 0x30e   :  { %v1073_v32 = vmul.f32 0.055555556, %v1066_v63  ;;  %v1336_v53 = vmul.f32 -1.442695, %v925_v43  ;;  %v927_v44 = vadd.f32 %v914_v11, %v440_v46  ;;  %v1057_v1 = vfloor.f32 %v1051_v50 }
 0x30f   :  { %1390 = vpow2.f32 %v1333_v18  ;;  %v1337_v58 = vmul.f32 -1.442695, %v926_v45  ;;  %v1052_v51 = vmul.f32 0.0026041667, %v1045_v27  ;;  %v1086_v26 = vmul.f32 18.0, %v1080_v2 }
 0x310   :  { %1392 = vpow2.f32 %v1334_v24  ;;  %v1079_v56 = vfloor.f32 %v1073_v32  ;;  %v1338_v59 = vmul.f32 -1.442695, %v927_v44  ;;  %v1063_v11 = vmul.f32 384.0, %v1057_v1 }
 0x311   :  { %1394 = vpow2.f32 %v1335_v62  ;;  %v1053_v28 = vmul.f32 0.0026041667, %v1046_v42  ;;  %v2209_v8 = vfloor.f32 %v1075_v10  ;;  %v1058_v29 = vfloor.f32 %v1052_v51 }
 0x312   :  { %1396 = vpow2.f32 %v1330_v49  ;;  %v1085_v54 = vmul.f32 18.0, %v1079_v56  ;;  %v1092_v17 = vsub.f32 %v1067_v35, %v1086_v26  ;;  %v2211_v22 = vsub.f32 %v1044_v41, %v1063_v11 }
 0x313   :  { %1398 = vpow2.f32 %v1331_v34  ;;  %v1059_v60 = vfloor.f32 %v1053_v28  ;;  %vm1097_vm10 = vcmp.ge.f32.partialorder %v1079_v56, 0.0  ;;  %vm1103_vm11 = vcmp.le.f32.partialorder %v1079_v56, 15.0 }
 0x314   :  { %1400 = vpow2.f32 %v1336_v53  ;;  %v1091_v30 = vsub.f32 %v1066_v63, %v1085_v54  ;;  %v1087_v61 = vmul.f32 18.0, %v2209_v8  ;;  %vm1098_vm12 = vcmp.ge.f32.partialorder %v1080_v2, 0.0  ;;  %vm2214_vm0 = vmand %vm1097_vm10, %vm1103_vm11 }
 0x315   :  { %1402 = vpow2.f32 %v1332_v55  ;;  %vm1104_vm13 = vcmp.le.f32.partialorder %v1080_v2, 15.0  ;;  %v1064_v31 = vmul.f32 384.0, %v1058_v29  ;;  %vm1116_vm1 = vcmp.ge.f32.partialorder %v1092_v17, 0.0 }
 0x316   :  { %1404 = vpow2.f32 %v1337_v58  ;;  %vm1115_vm14 = vcmp.ge.f32.partialorder %v1091_v30, 0.0  ;;  %vm1121_vm15 = vcmp.le.f32.partialorder %v1091_v30, 15.0  ;;  %vm1122_vm2 = vcmp.le.f32.partialorder %v1092_v17, 15.0  ;;  %vm2220_vm3 = vmand %vm1098_vm12, %vm1104_vm13 }
 0x317   :  { %1406 = vpow2.f32 %v1338_v59  ;;  %v1076_v24 = vmul.f32 0.055555556, %v2211_v22  ;;  %v1065_v40 = vmul.f32 384.0, %v1059_v60  ;;  %v1093_v62 = vsub.f32 %v1068_v37, %v1087_v61  ;;  %vm2224_vm4 = vmand %vm1115_vm14, %vm1121_vm15 }
 0x318   :  { %v1385_v5 = vpop.eup %1384  ;;  %v2228_v35 = vsub.f32 %v1045_v27, %v1064_v31  ;;  %vm2230_vm5 = vmand %vm1116_vm1, %vm1122_vm2  ;;  %vm1099_vm6 = vcmp.ge.f32.partialorder %v2209_v8, 0.0  ;;  %vm1105_vm7 = vcmp.le.f32.partialorder %v2209_v8, 15.0 }
 0x319   :  { %v1387_v47 = vpop.eup %1386  ;;  %v988_v57 = vadd.f32 1.0, %v1385_v5  ;;  %v2236_v34 = vfloor.f32 %v1076_v24  ;;  %v2242_v46 = vsub.f32 %v1046_v42, %v1065_v40  ;;  %vm1133_vm8 = vmand %vm2214_vm0, %vm2224_vm4  ;;  %vm1117_vm9 = vcmp.ge.f32.partialorder %v1093_v62, 0.0  ;;  %v2267_v5 = vpop.permute.xlu1 %666 }
 0x31a   :  { %v1389_v7 = vpop.eup %1388  ;;  %v989_v23 = vadd.f32 1.0, %v1387_v47  ;;  %vm1123_vm10 = vcmp.le.f32.partialorder %v1093_v62, 15.0  ;;  %vm1134_vm11 = vmand %vm2220_vm3, %vm2230_vm5  ;;  %v1077_v52 = vmul.f32 0.055555556, %v2228_v35  ;;  %v1139_v54 = vsel %vm1133_vm8, 0.00390625, %v1457_v3 }
 0x31b   :  { %v990_v15 = vadd.f32 1.0, %v1389_v7  ;;  %1408 = vrcp.f32 %v988_v57  ;;  %vm2263_vm12 = vmand %vm1099_vm6, %vm1105_vm7  ;;  %v1088_v1 = vmul.f32 18.0, %v2236_v34  ;;  %v1078_v47 = vmul.f32 0.055555556, %v2242_v46 }
 0x31c   :  { %v1391_v13 = vpop.eup %1390  ;;  %1410 = vrcp.f32 %v989_v23  ;;  %vm2272_vm13 = vmand %vm1117_vm9, %vm1123_vm10  ;;  %v1140_v7 = vsel %vm1134_vm11, 0.00390625, %v1457_v3  ;;  %v2291_v11 = vfloor.f32 %v1077_v52  ;;  %vm1100_vm15 = vcmp.ge.f32.partialorder %v2236_v34, 0.0 }
 0x31d   :  { %v1393_v12 = vpop.eup %1392  ;;  %v994_v16 = vadd.f32 1.0, %v1391_v13  ;;  %1412 = vrcp.f32 %v990_v15  ;;  %vm1135_vm14 = vmand %vm2263_vm12, %vm2272_vm13  ;;  %v2302_v17 = vfloor.f32 %v1078_v47  ;;  %vm1106_vm0 = vcmp.le.f32.partialorder %v2236_v34, 15.0 }
 0x31e   :  { %v1395_v14 = vpop.eup %1394  ;;  %v995_v19 = vadd.f32 1.0, %v1393_v12  ;;  %v1089_v36 = vmul.f32 18.0, %v2291_v11  ;;  %vm2330_vm3 = vmand %vm1100_vm15, %vm1106_vm0  ;;  %vm1101_vm5 = vcmp.ge.f32.partialorder %v2291_v11, 0.0  ;;  %vm1107_vm6 = vcmp.le.f32.partialorder %v2291_v11, 15.0 }
 0x31f   :  { %v1397_v21 = vpop.eup %1396  ;;  %v996_v18 = vadd.f32 1.0, %v1395_v14  ;;  %1414 = vrcp.f32 %v994_v16  ;;  %v1094_v14 = vsub.f32 %v2211_v22, %v1088_v1  ;;  %vm1102_vm10 = vcmp.ge.f32.partialorder %v2302_v17, 0.0  ;;  %vm2354_vm12 = vmand %vm1101_vm5, %vm1107_vm6 }
 0x320   :  { %v1399_v0 = vpop.eup %1398  ;;  %1416 = vrcp.f32 %v995_v19  ;;  %v991_v41 = vadd.f32 1.0, %v1397_v21  ;;  %vm1108_vm11 = vcmp.le.f32.partialorder %v2302_v17, 15.0 }
 0x321   :  { %v1401_v6 = vpop.eup %1400  ;;  %v992_v43 = vadd.f32 1.0, %v1399_v0  ;;  %1418 = vrcp.f32 %v996_v18  ;;  %v1141_v0 = vsel %vm1135_vm14, 0.00390625, %v1457_v3  ;;  %vm1118_vm1 = vcmp.ge.f32.partialorder %v1094_v14, 0.0  ;;  %vm2363_vm0 = vmand %vm1102_vm10, %vm1108_vm11 }
 0x322   :  { %v1403_v49 = vpop.eup %1402  ;;  %v997_v32 = vadd.f32 1.0, %v1401_v6  ;;  %1420 = vrcp.f32 %v991_v41  ;;  %vm1124_vm2 = vcmp.le.f32.partialorder %v1094_v14, 15.0 }
 0x323   :  { %v2249_v50 = vpop.eup %1404  ;;  %v993_v56 = vadd.f32 1.0, %v1403_v49  ;;  %1422 = vrcp.f32 %v992_v43  ;;  %v1090_v43 = vmul.f32 18.0, %v2302_v17  ;;  %vm2335_vm4 = vmand %vm1118_vm1, %vm1124_vm2 }
 0x324   :  { %v2256_v45 = vpop.eup %1406  ;;  %1424 = vrcp.f32 %v997_v32  ;;  %v998_v32 = vadd.f32 1.0, %v2249_v50  ;;  %vm1136_vm9 = vmand %vm2330_vm3, %vm2335_vm4  ;;  %vm1167_vm3 = vcmask 15368  }
 0x325   :  { %1426 = vrcp.f32 %v993_v56  ;;  %v1096_v56 = vsub.f32 %v2242_v46, %v1090_v43  ;;  %v1142_v17 = vsel %vm1136_vm9, 0.00390625, %v1457_v3 }
 0x326   :  { %1428 = vrcp.f32 %v998_v32 }
 0x327   :  { %vm1120_vm13 = vcmp.ge.f32.partialorder %v1096_v56, 0.0  ;;  %vm1126_vm14 = vcmp.le.f32.partialorder %v1096_v56, 15.0 }
 0x328   :  { %v1409_v55 = vpop.eup %1408  ;;  %vm2367_vm1 = vmand %vm1120_vm13, %vm1126_vm14 }
 0x329   :  { %v1411_v58 = vpop.eup %1410  ;;  %vm1138_vm5 = vmand %vm2363_vm0, %vm2367_vm1 }
 0x32a   :  { %v1413_v15 = vpop.eup %1412 }
 0x32c   :  { %v1415_v31 = vpop.eup %1414 }
 0x32d   :  { %v1417_v22 = vpop.eup %1416 }
 0x32e   :  { %v1419_v6 = vpop.eup %1418 }
 0x32f   :  { %v1421_v50 = vpop.eup %1420 }
 0x330   :  { %v1423_v42 = vpop.eup %1422 }
 0x3ae   :  { %v741_v38 = vpop.f32.mrf.mxu1 }
 0x3af   :  { %v742_v33 = vadd.f32 %v741_v38, %v2234_v39 }
 0x3b0   :  { %v743_v53 = vpop.f32.mrf.mxu1 }
 0x3b1   :  { %v928_v37 = vmul.f32 0.2, %v742_v33  ;;  %v744_v44 = vadd.f32 %v743_v53, %v2234_v39 }
 0x3b2   :  { %v747_v2 = vpop.f32.mrf.mxu1 }
 0x3b3   :  { %v940_v10 = vmax.f32 %v742_v33, %v928_v37  ;;  %v929_v59 = vmul.f32 0.2, %v744_v44  ;;  %v748_v51 = vadd.f32 %v747_v2, %v2267_v5  ;;  %v818_v57 = vpop.f32.mrf.mxu0  ;;  %v1095_v37 = vsub.f32 %v2228_v35, %v1089_v36 }
 0x3b4   :  { %v819_v23 = vadd.f32 %v818_v57, %v2234_v39  ;;  %v749_v26 = vpop.f32.mrf.mxu1 }
 0x3b5   :  { %v2293_v28 = vmul.f32 %v1409_v55, %v940_v10  ;;  %v941_v8 = vmax.f32 %v744_v44, %v929_v59  ;;  %v934_v13 = vmul.f32 0.2, %v748_v51  ;;  %v750_v29 = vadd.f32 %v749_v26, %v2267_v5  ;;  %v820_v12 = vpop.f32.mrf.mxu0  ;;  %v1425_v10 = vpop.eup %1424 }
 0x3b6   :  { %v930_v30 = vmul.f32 0.2, %v819_v23  ;;  %v821_v49 = vadd.f32 %v820_v12, %v2234_v39  ;;  %v999_v44 = vadd.f32 1.0, %v2256_v45  ;;  %vm1119_vm7 = vcmp.ge.f32.partialorder %v1095_v37, 0.0 }
 0x3b7   :  { %v2304_v60 = vmul.f32 %v1411_v58, %v941_v8  ;;  %v946_v16 = vmax.f32 %v748_v51, %v934_v13  ;;  %v935_v61 = vmul.f32 0.2, %v750_v29  ;;  %v824_v19 = vpop.f32.mrf.mxu0  ;;  %v1145_v24 = vmul.f32 %v1139_v54, %v2293_v28 }
 0x3b8   :  { %v942_v21 = vmax.f32 %v819_v23, %v930_v30  ;;  %v825_v18 = vadd.f32 %v824_v19, %v2267_v5  ;;  %v931_v47 = vmul.f32 0.2, %v821_v49  ;;  %vm1125_vm8 = vcmp.le.f32.partialorder %v1095_v37, 15.0 }
 0x3b9   :  { %v1146_v40 = vmul.f32 %v1140_v7, %v2304_v60  ;;  %v2312_v25 = vmul.f32 %v1415_v31, %v946_v16  ;;  %v947_v62 = vmax.f32 %v750_v29, %v935_v61  ;;  %v826_v53 = vpop.f32.mrf.mxu0  ;;  %1430 = vrcp.f32 %v999_v44  ;;  %vm2358_vm15 = vmand %vm1119_vm7, %vm1125_vm8 }
 0x3ba   :  { %v2314_v63 = vmul.f32 %v1413_v15, %v942_v21  ;;  %v936_v41 = vmul.f32 0.2, %v825_v18  ;;  %v827_v34 = vadd.f32 %v826_v53, %v2267_v5  ;;  %v943_v57 = vmax.f32 %v821_v49, %v931_v47  ;;  %vm1137_vm2 = vmand %vm2354_vm12, %vm2358_vm15  ;;  %v1427_v21 = vpop.eup %1426 }
 0x3bb   :  { %v2317_v20 = vmul.f32 %v1417_v22, %v947_v62  ;;  %v1157_v38 = vadd.f32 %v1146_v40, %v1145_v24  ;;  %v1151_v27 = vmul.f32 %v1139_v54, %v2312_v25  ;;  %v1144_v62 = vsel %vm1138_vm5, 0.00390625, %v1457_v3 }
 0x3bc   :  { %v948_v33 = vmax.f32 %v825_v18, %v936_v41  ;;  %v1147_v52 = vmul.f32 %v1141_v0, %v2314_v63  ;;  %v937_v54 = vmul.f32 0.2, %v827_v34  ;;  %v2376_v15 = vmul.f32 %v1421_v50, %v943_v57 }
 0x3bd   :  { %v1152_v55 = vmul.f32 %v1140_v7, %v2317_v20  ;;  %v1180_v23 = vshrl.u32 %v42_v9, 7 }
 0x3be   :  { %v2339_v35 = vmul.f32 %v1419_v6, %v948_v33  ;;  %v1158_v45 = vadd.f32 %v1157_v38, %v1147_v52  ;;  %v949_v30 = vmax.f32 %v827_v34, %v937_v54  ;;  %v1148_v24 = vmul.f32 %v1142_v17, %v2376_v15  ;;  %v1429_v38 = vpop.eup %1428 }
 0x3bf   :  { %v1161_v58 = vadd.f32 %v1152_v55, %v1151_v27 }
 0x3c0   :  { %1159 = vadd.xlane.f32.xlu0 %v1158_v45  ;;  %v1153_v59 = vmul.f32 %v1141_v0, %v2339_v35  ;;  %v2394_v40 = vmul.f32 %v1425_v10, %v949_v30  ;;  %v1448_v45 = vld [vmem:[%s2476_s2] sm:$0xff] }
 0x3c2   :  { %v1162_v51 = vadd.f32 %v1161_v58, %v1153_v59  ;;  %v1154_v37 = vmul.f32 %v1142_v17, %v2394_v40 }
 0x3c3   :  { %v895_v7 = vpop.f32.mrf.mxu1 }
 0x3c4   :  { %v896_v26 = vadd.f32 %v895_v7, %v2234_v39  ;;  %1163 = vadd.xlane.f32.xlu1 %v1162_v51 }
 0x3c5   :  { %v897_v11 = vpop.f32.mrf.mxu1 }
 0x3c6   :  { %v932_v29 = vmul.f32 0.2, %v896_v26  ;;  %v898_v12 = vadd.f32 %v897_v11, %v2234_v39  ;;  %v1143_v39 = vsel %vm1137_vm2, 0.00390625, %v1457_v3 }
 0x3c7   :  { %v901_v14 = vpop.f32.mrf.mxu1 }
 0x3c8   :  { %v944_v16 = vmax.f32 %v896_v26, %v932_v29  ;;  %v933_v61 = vmul.f32 0.2, %v898_v12  ;;  %v902_v19 = vadd.f32 %v901_v14, %v2267_v5  ;;  %v1181_v29 = vsub.s32 0, %v1180_v23 }
 0x3c9   :  { %v903_v31 = vpop.f32.mrf.mxu1 }
 0x3ca   :  { %v2390_v18 = vmul.f32 %v1423_v42, %v944_v16  ;;  %v945_v0 = vmax.f32 %v898_v12, %v933_v61  ;;  %v938_v36 = vmul.f32 0.2, %v902_v19  ;;  %v904_v22 = vadd.f32 %v903_v31, %v2267_v5  ;;  %v1431_v5 = vpop.eup %1430 }
 0x3cc   :  { %v1149_v6 = vmul.f32 %v1143_v39, %v2390_v18  ;;  %v2398_v41 = vmul.f32 %v1427_v21, %v945_v0  ;;  %v950_v43 = vmax.f32 %v902_v19, %v938_v36  ;;  %v939_v49 = vmul.f32 0.2, %v904_v22 }
 0x3ce   :  { %v2400_v32 = vmul.f32 %v1429_v38, %v950_v43  ;;  %v951_v33 = vmax.f32 %v904_v22, %v939_v49  ;;  %v1150_v53 = vmul.f32 %v1144_v62, %v2398_v41  ;;  %v1233_v52 = vadd.f32 %v1149_v6, %v1148_v24 }
 0x3d0   :  { %v1155_v44 = vmul.f32 %v1143_v39, %v2400_v32  ;;  %v2405_v27 = vmul.f32 %v1431_v5, %v951_v33  ;;  %v1234_v3 = vadd.f32 %v1233_v52, %v1150_v53 }
 0x3d2   :  { %1235 = vadd.xlane.f32.xlu0 %v1234_v3  ;;  %v1156_v55 = vmul.f32 %v1144_v62, %v2405_v27  ;;  %v1237_v2 = vadd.f32 %v1155_v44, %v1154_v37  ;;  %v1462_v62 = vmov 2   ;;  %v1449_v3 = vld [vmem:[%s2476_s2 + $0x8] sm:$0xff] }
 0x3d3   :  { %1358 = vset.pattern.permute.xlu0 %v1462_v62  ;;  %1359 = vset.pattern.permute.xlu1 %v1462_v62 }
 0x3d4   :  { %v1238_v50 = vadd.f32 %v1237_v2, %v1156_v55 }
 0x3d6   :  { %1239 = vadd.xlane.f32.xlu0 %v1238_v50 }
 0x449   :  { %v1160_v1 = vpop.xlane.xlu0 %1159 }
 0x44a   :  { %v1165_v56 = vmul.f32 %v1448_v45, %v1160_v1 }
 0x44c   :  { %v1168_v34 = vsel %vm1167_vm3, %v1165_v56, 0.0 }
 0x44d   :  { %v1164_v42 = vpop.xlane.xlu1 %1163 }
 0x44e   :  { %v1166_v47 = vmul.f32 %v1164_v42, %v1969_v4 }
 0x450   :  { %v1169_v58 = vsel %vm1167_vm3, %v1166_v47, 0.0 }
 0x451   :  { %v1170_v10 = vadd.f32 %v1169_v58, %v1168_v34 }
 0x453   :  { %v1171_v59 = vrot.slane %v1170_v10, 4 }
 0x455   :  { %v1172_v46 = vadd.f32 %v1171_v59, %v1170_v10 }
 0x457   :  { %v1173_v51 = vrot.slane %v1172_v46, 2 }
 0x459   :  { %v1174_v57 = vadd.f32 %v1173_v51, %v1172_v46 }
 0x45b   :  { %v1175_v54 = vrot.slane %v1174_v57, 1  ;;  %v1236_v7 = vpop.xlane.xlu0 %1235 }
 0x45c   :  { %v1241_v8 = vmul.f32 %v1448_v45, %v1236_v7 }
 0x45d   :  { %v1176_v26 = vadd.f32 %v1175_v54, %v1174_v57 }
 0x45e   :  { %v1243_v14 = vsel %vm1167_vm3, %v1241_v8, 0.0 }
 0x45f   :  { %v1240_v11 = vpop.xlane.xlu0 %1239  ;;  %v1177_v13 = vadd.f32 %v1176_v26, %v1977_v48 }
 0x460   :  { %v1242_v12 = vmul.f32 %v1240_v11, %v1969_v4 }
 0x461   :  { %v1178_v30 = vmax.f32 %v1177_v13, 0.0 }
 0x462   :  { %v1244_v17 = vsel %vm1167_vm3, %v1242_v12, 0.0 }
 0x463   :  { %v1245_v16 = vadd.f32 %v1244_v17, %v1243_v14  ;;  %v1182_v61 = vrot.slane %v1178_v30, %v1181_v29 }
 0x465   :  { %v1246_v19 = vrot.slane %v1245_v16, 4  ;;  %1184 = vrot.lane.b32.xlu1 %v1182_v61, %s1461_s27 }
 0x467   :  { %v1247_v39 = vadd.f32 %v1246_v19, %v1245_v16 }
 0x469   :  { %v1248_v9 = vrot.slane %v1247_v39, 2  ;;  %1191 = vrot.lane.b32.xlu1 %v1448_v45, %s1458_s25 }
 0x46b   :  { %v1249_v31 = vadd.f32 %v1248_v9, %v1247_v39 }
 0x46d   :  { %v1250_v21 = vrot.slane %v1249_v31, 1  ;;  %1193 = vrot.lane.b32.xlu1 %v1969_v4, %s1458_s25 }
 0x46f   :  { %v1251_v0 = vadd.f32 %v1250_v21, %v1249_v31 }
 0x471   :  { %v1252_v36 = vadd.f32 %v1251_v0, %v1977_v48 }
 0x473   :  { %v1253_v22 = vmax.f32 %v1252_v36, 0.0 }
 0x475   :  { %v1257_v24 = vrot.slane %v1253_v22, %v1181_v29 }
 0x477   :  { %1259 = vrot.lane.b32.xlu0 %v1257_v24, %s1461_s27 }
 0x4d7   :  { %v1185_v6 = vpop.permute.xlu1 %1184 }
 0x4d8   :  { %v1187_v43 = vmul.f32 %v1448_v45, %v1185_v6  ;;  %v1188_v33 = vmul.f32 %v1185_v6, %v1969_v4 }
 0x4db   :  { %v1192_v49 = vpop.permute.xlu1 %1191 }
 0x4dc   :  { %v1197_v38 = vadd.f32 %v1192_v49, %v1187_v43 }
 0x4de   :  { %v1339_v53 = vmul.f32 -1.442695, %v1197_v38 }
 0x4df   :  { %v1194_v52 = vpop.permute.xlu1 %1193 }
 0x4e0   :  { %1432 = vpow2.f32 %v1339_v53  ;;  %v1198_v5 = vadd.f32 %v1194_v52, %v1188_v33 }
 0x4e2   :  { %v1340_v37 = vmul.f32 -1.442695, %v1198_v5 }
 0x4e4   :  { %1434 = vpow2.f32 %v1340_v37 }
 0x4e9   :  { %v1260_v44 = vpop.permute.xlu0 %1259 }
 0x4ea   :  { %v1262_v48 = vmul.f32 %v1448_v45, %v1260_v44  ;;  %v1263_v55 = vmul.f32 %v1449_v3, %v1260_v44 }
 0x4ec   :  { %v1266_v2 = vadd.f32 %v1262_v48, %v1192_v49  ;;  %v1267_v50 = vadd.f32 %v1263_v55, %v1194_v52 }
 0x4ed   :  { %v1433_v1 = vpop.eup %1432 }
 0x4ee   :  { %v1205_v56 = vadd.f32 1.0, %v1433_v1  ;;  %v1341_v42 = vmul.f32 -1.442695, %v1266_v2  ;;  %v1342_v47 = vmul.f32 -1.442695, %v1267_v50 }
 0x4f0   :  { %1436 = vrcp.f32 %v1205_v56 }
 0x4f1   :  { %v1435_v4 = vpop.eup %1434  ;;  %1438 = vpow2.f32 %v1341_v42 }
 0x4f2   :  { %v1206_v34 = vadd.f32 1.0, %v1435_v4  ;;  %1440 = vpow2.f32 %v1342_v47 }
 0x4f4   :  { %1442 = vrcp.f32 %v1206_v34 }
 0x4fd   :  { %v1437_v58 = vpop.eup %1436 }
 0x4fe   :  { %v1439_v10 = vpop.eup %1438  ;;  %1213 = vperm.xlu0 %1358, %v1437_v58  }
 0x4ff   :  { %v1441_v45 = vpop.eup %1440  ;;  %v1274_v59 = vadd.f32 1.0, %v1439_v10 }
 0x500   :  { %v1275_v46 = vadd.f32 1.0, %v1441_v45 }
 0x501   :  { %v1443_v51 = vpop.eup %1442  ;;  %1444 = vrcp.f32 %v1274_v59 }
 0x502   :  { %1446 = vrcp.f32 %v1275_v46  ;;  %1218 = vperm.xlu1 %1359, %v1443_v51  }
 0x50e   :  { %v1445_v57 = vpop.eup %1444 }
 0x50f   :  { %v1447_v54 = vpop.eup %1446  ;;  %1282 = vperm.xlu1 %1359, %v1445_v57  }
 0x510   :  { %1287 = vperm.xlu0 %1358, %v1447_v54  }
 0x579   :  { %v1214_v7 = vpop.permute.xlu0 %1213 }
 0x57a   :  { %v1221_v23 = vmul.f32 %v1214_v7, %v2293_v28  ;;  %v1222_v26 = vmul.f32 %v1214_v7, %v2304_v60  ;;  %v1223_v8 = vmul.f32 %v1214_v7, %v2314_v63 }
 0x57c   :  { %1227 = vst [vmem:[%s2478_s3] sm:$0xff] %v1221_v23  ;;  %1228 = vst [vmem:[%s2478_s3 + $0x8] sm:$0xff] %v1222_v26 }
 0x57d   :  { %1229 = vst [vmem:[%s2478_s3 + $0x10] sm:$0xff] %v1223_v8  ;;  %v1219_v11 = vpop.permute.xlu1 %1218 }
 0x57e   :  { %v1224_v13 = vmul.f32 %v1219_v11, %v2312_v25  ;;  %v1225_v28 = vmul.f32 %v1219_v11, %v2317_v20  ;;  %v1226_v60 = vmul.f32 %v1219_v11, %v2339_v35 }
 0x580   :  { %1230 = vst [vmem:[%s2478_s3 + $0x30] sm:$0xff] %v1224_v13  ;;  %1231 = vst [vmem:[%s2478_s3 + $0x38] sm:$0xff] %v1225_v28 }
 0x581   :  { %1232 = vst [vmem:[%s2478_s3 + $0x40] sm:$0xff] %v1226_v60 }
 0x58a   :  { %v1283_v63 = vpop.permute.xlu1 %1282 }
 0x58b   :  { %v1290_v29 = vmul.f32 %v1283_v63, %v2376_v15  ;;  %v1291_v25 = vmul.f32 %v1283_v63, %v2390_v18  ;;  %v1292_v20 = vmul.f32 %v1283_v63, %v2398_v41  ;;  %v1288_v35 = vpop.permute.xlu0 %1287 }
 0x58c   :  { %v1293_v12 = vmul.f32 %v1288_v35, %v2394_v40  ;;  %v1294_v30 = vmul.f32 %v1288_v35, %v2400_v32  ;;  %v1295_v14 = vmul.f32 %v1288_v35, %v2405_v27 }
 0x58d   :  { %1296 = vst [vmem:[%s2478_s3 + $0x18] sm:$0xff] %v1290_v29  ;;  %1297 = vst [vmem:[%s2478_s3 + $0x20] sm:$0xff] %v1291_v25 }
 0x58e   :  { %1298 = vst [vmem:[%s2478_s3 + $0x28] sm:$0xff] %v1292_v20  ;;  %1299 = vst [vmem:[%s2478_s3 + $0x48] sm:$0xff] %v1293_v12 }
 0x58f   :  { %1300 = vst [vmem:[%s2478_s3 + $0x50] sm:$0xff] %v1294_v30  ;;  %1301 = vst [vmem:[%s2478_s3 + $0x58] sm:$0xff] %v1295_v14 }

</bundles_post_ra>
